<compile_context>
chip_gen: v5e
topology: v5e:2x2
jax: 0.10.0
libtpu: 0.0.40
codegen_flags: <defaults>
</compile_context>

<pallas_src>
import functools
import math

import jax
import jax.numpy as jnp
from jax import lax
from jax.experimental import pallas as pl
from jax.experimental.pallas import tpu as pltpu

_VMEM_LIMIT = 32 * 1024 * 1024


def _round_up(x, m):
    return ((x + m - 1) // m) * m


def _choose_tile_m(M):
    # biggest row tile that divides M while still leaving >= 2 grid steps
    for tm in (512, 256, 128, 64, 32, 16, 8):
        if M % tm == 0 and M // tm >= 2:
            return tm
    return M


# ----------------------------------------------------------------------------
# Kernel 1: fused (block-diagonal) input projection
# ----------------------------------------------------------------------------
def _in_proj_kernel(x_ref, w_ref, b_ref, o_ref):
    x = x_ref[...].astype(jnp.bfloat16)
    o_ref[...] = (
        jnp.dot(x, w_ref[...], preferred_element_type=jnp.float32) + b_ref[...]
    )


def fused_input_proj(x2d, w_bd, b_bd):
    # x2d: (M, Dtot) f32, w_bd: (Dtot, Np) bf16, b_bd: (1, Np) f32
    M, K = x2d.shape
    Np = w_bd.shape[1]
    tm = _choose_tile_m(M)
    return pl.pallas_call(
        _in_proj_kernel,
        grid=(M // tm,),
        in_specs=[
            pl.BlockSpec((tm, K), lambda i: (i, 0)),
            pl.BlockSpec((K, Np), lambda i: (0, 0)),
            pl.BlockSpec((1, Np), lambda i: (0, 0)),
        ],
        out_specs=pl.BlockSpec((tm, Np), lambda i: (i, 0)),
        out_shape=jax.ShapeDtypeStruct((M, Np), jnp.float32),
        compiler_params=pltpu.CompilerParams(
            dimension_semantics=("parallel",), vmem_limit_bytes=_VMEM_LIMIT
        ),
    )(x2d, w_bd, b_bd)


# ----------------------------------------------------------------------------
# Kernel 2: fully fused pre-LN transformer encoder layer (one batch row / step)
# ----------------------------------------------------------------------------
def _encoder_layer_kernel(
    x_ref, m_ref,
    ln1g_ref, ln1b_ref, qkvw_ref, qkvb_ref, projw_ref, projb_ref,
    ln2g_ref, ln2b_ref, fc1w_ref, fc1b_ref, fc2w_ref, fc2b_ref,
    o_ref, *, num_heads,
):
    x = x_ref[0]                                   # (S, De) f32
    S, De = x.shape
    H = num_heads
    Dh = De // H

    def _ln(v, g, b):
        mu = jnp.mean(v, axis=-1, keepdims=True)
        d = v - mu
        var = jnp.mean(d * d, axis=-1, keepdims=True)
        return d * lax.rsqrt(var + 1e-5) * g + b

    # ---- attention sublayer (pre-LN) ----
    h = _ln(x, ln1g_ref[...], ln1b_ref[...])
    qkv = (
        jnp.dot(h.astype(jnp.bfloat16), qkvw_ref[...],
                preferred_element_type=jnp.float32)
        + qkvb_ref[...]
    )                                              # (S, 3*De)
    m = m_ref[0]                                   # (1, S) key-padding mask
    bias = jnp.where(m > 0, 0.0, -1e9)             # nonzero = attend
    scale = 1.0 / math.sqrt(Dh)

    # TODO(synk): per-head full-score softmax; for large S this should become a
    # flash-style online-softmax with a KV grid axis.
    heads = []
    for hh in range(H):
        q = qkv[:, hh * Dh:(hh + 1) * Dh].astype(jnp.bfloat16)
        k = qkv[:, De + hh * Dh:De + (hh + 1) * Dh].astype(jnp.bfloat16)
        v = qkv[:, 2 * De + hh * Dh:2 * De + (hh + 1) * Dh].astype(jnp.bfloat16)
        s = lax.dot_general(
            q, k, (((1,), (1,)), ((), ())), preferred_element_type=jnp.float32
        ) * scale + bias                            # (S, S)
        s = s - jnp.max(s, axis=-1, keepdims=True)
        p = jnp.exp(s)
        p = p * pl.reciprocal(jnp.sum(p, axis=-1, keepdims=True), approx=True)
        heads.append(
            jnp.dot(p.astype(jnp.bfloat16), v, preferred_element_type=jnp.float32)
        )
    a = jnp.concatenate(heads, axis=-1)             # (S, De)
    a = (
        jnp.dot(a.astype(jnp.bfloat16), projw_ref[...],
                preferred_element_type=jnp.float32)
        + projb_ref[...]
    )
    x = x + a                                       # residual

    # ---- MLP sublayer (pre-LN) ----
    h2 = _ln(x, ln2g_ref[...], ln2b_ref[...])
    m1 = (
        jnp.dot(h2.astype(jnp.bfloat16), fc1w_ref[...],
                preferred_element_type=jnp.float32)
        + fc1b_ref[...]
    )
    # TODO(synk): OurBlock undefined in the reference; tanh-approx GELU used
    # (PyTorch nn.GELU default is exact erf).
    m1 = jax.nn.gelu(m1, approximate=True)
    m2 = (
        jnp.dot(m1.astype(jnp.bfloat16), fc2w_ref[...],
                preferred_element_type=jnp.float32)
        + fc2b_ref[...]
    )
    o_ref[0] = x + m2                               # residual


def encoder_layer(x, mask, lp, num_heads):
    # x: (BT, S, De) f32 (BT = 3*B, modalities stacked on batch axis)
    # mask: (BT, 1, S) f32, nonzero = attend
    BT, S, De = x.shape
    bf16 = jnp.bfloat16
    hidden = lp["fc1_w"].shape[1]
    ops = (
        lp["ln1_g"].reshape(1, De), lp["ln1_b"].reshape(1, De),
        lp["qkv_w"].astype(bf16), lp["qkv_b"].reshape(1, -1),
        lp["proj_w"].astype(bf16), lp["proj_b"].reshape(1, -1),
        lp["ln2_g"].reshape(1, De), lp["ln2_b"].reshape(1, De),
        lp["fc1_w"].astype(bf16), lp["fc1_b"].reshape(1, -1),
        lp["fc2_w"].astype(bf16), lp["fc2_b"].reshape(1, -1),
    )
    x_spec = pl.BlockSpec((1, S, De), lambda b: (b, 0, 0))
    m_spec = pl.BlockSpec((1, 1, S), lambda b: (b, 0, 0))
    w_specs = [pl.BlockSpec(o.shape, lambda b: (0, 0)) for o in ops]

    tokens = BT * S
    H = num_heads
    flops = (
        2 * tokens * De * (3 * De + De + 2 * hidden)
        + 4 * BT * H * S * S * (De // H)
    )
    transcendentals = BT * H * S * S + tokens * hidden
    bytes_accessed = (
        2 * tokens * De * 4
        + 2 * (De * 3 * De + De * De + 2 * De * hidden)
        + BT * S * 4
    )

    return pl.pallas_call(
        functools.partial(_encoder_layer_kernel, num_heads=num_heads),
        grid=(BT,),
        in_specs=[x_spec, m_spec] + w_specs,
        out_specs=x_spec,
        out_shape=jax.ShapeDtypeStruct((BT, S, De), jnp.float32),
        compiler_params=pltpu.CompilerParams(
            dimension_semantics=("parallel",), vmem_limit_bytes=_VMEM_LIMIT
        ),
        cost_estimate=pl.CostEstimate(
            flops=flops, transcendentals=transcendentals,
            bytes_accessed=bytes_accessed,
        ),
    )(x, mask, *ops)


# ----------------------------------------------------------------------------
# Kernel 3: fused heads + mask-zero + proj1/ReLU/residual + nlp_head
# ----------------------------------------------------------------------------
def _final_kernel(x_ref, mf_ref, hw_ref, hb_ref, p1w_ref, p1b_ref,
                  ow_ref, ob_ref, out_ref, heads_ref):
    x = x_ref[...]                                  # (tm, 3*De) unmasked
    # per-modality heads on the UNmasked activations (block-diag, lane-padded)
    heads_ref[...] = (
        jnp.dot(x.astype(jnp.bfloat16), hw_ref[...],
                preferred_element_type=jnp.float32)
        + hb_ref[...]
    )
    # mask-zero -> x_joint -> proj1 + ReLU + residual -> nlp_head
    xj = x * mf_ref[...]
    u = (
        jnp.dot(xj.astype(jnp.bfloat16), p1w_ref[...],
                preferred_element_type=jnp.float32)
        + p1b_ref[...]
    )
    hidden = jnp.maximum(u, 0.0) + xj
    out_ref[...] = (
        jnp.dot(hidden.astype(jnp.bfloat16), ow_ref[...],
                preferred_element_type=jnp.float32)
        + ob_ref[...]
    )


def fused_final(x_feat, mask_feat, heads_w, heads_b, p1_w, p1_b, out_w, out_b):
    M, D = x_feat.shape
    CpH = heads_w.shape[1]
    CpO = out_w.shape[1]
    tm = _choose_tile_m(M)

    def row(n):
        return pl.BlockSpec((tm, n), lambda i: (i, 0))

    def full(arr):
        return pl.BlockSpec(arr.shape, lambda i: (0, 0))

    return pl.pallas_call(
        _final_kernel,
        grid=(M // tm,),
        in_specs=[row(D), row(D), full(heads_w), full(heads_b),
                  full(p1_w), full(p1_b), full(out_w), full(out_b)],
        out_specs=[row(CpO), row(CpH)],
        out_shape=[jax.ShapeDtypeStruct((M, CpO), jnp.float32),
                   jax.ShapeDtypeStruct((M, CpH), jnp.float32)],
        compiler_params=pltpu.CompilerParams(
            dimension_semantics=("parallel",), vmem_limit_bytes=_VMEM_LIMIT
        ),
    )(x_feat, mask_feat, heads_w, heads_b, p1_w, p1_b, out_w, out_b)


# ----------------------------------------------------------------------------
# Model forward (first_stage=True, eval mode)
# ----------------------------------------------------------------------------
def our_model_forward(params, inputfeats, input_features_mask, umask,
                      adim, tdim, vdim, num_heads):
    # inputfeats: (S, B, adim+tdim+vdim); input_features_mask: (S, B, 3);
    # umask: (B, S)
    S, B, Dtot = inputfeats.shape
    De = params["a_w"].shape[1]
    C = params["head_a_w"].shape[1]
    M = B * S
    bf16 = jnp.bfloat16

    # ---- modality split + permute(1,0,2) + fused block-diag input projection
    x2d = inputfeats.transpose(1, 0, 2).reshape(M, Dtot)
    Np_in = max(128, _round_up(3 * De, 128))
    w_in = jnp.zeros((Dtot, Np_in), jnp.float32)
    w_in = w_in.at[:adim, 0:De].set(params["a_w"])
    w_in = w_in.at[adim:adim + tdim, De:2 * De].set(params["t_w"])
    w_in = w_in.at[adim + tdim:, 2 * De:3 * De].set(params["v_w"])
    b_in = jnp.zeros((1, Np_in), jnp.float32)
    b_in = b_in.at[0, 0:De].set(params["a_b"])
    b_in = b_in.at[0, De:2 * De].set(params["t_b"])
    b_in = b_in.at[0, 2 * De:3 * De].set(params["v_b"])
    proj = fused_input_proj(x2d, w_in.astype(bf16), b_in)       # (M, Np_in)
    proj = proj[:, :3 * De].reshape(B, S, 3, De)
    # dropout_a / dropout_t / dropout_v: identity in eval mode

    # stack modalities on batch axis -> (3B, S, De)
    x_enc = proj.transpose(2, 0, 1, 3).reshape(3 * B, S, De)

    # masks
    input_mask = input_features_mask.transpose(1, 0, 2)          # (B, S, 3)
    input_mask = jnp.where(umask[:, :, None] == 0, 0.0, input_mask)
    mask_stacked = input_mask.transpose(2, 0, 1).reshape(3 * B, 1, S)

    # shared-weight transformer applied once to the stacked modalities
    for lp in params["block"]["layers"]:
        x_enc = encoder_layer(x_enc, mask_stacked, lp, num_heads)

    x_a = x_enc[0 * B:1 * B]
    x_t = x_enc[1 * B:2 * B]
    x_v = x_enc[2 * B:3 * B]
    x_feat = jnp.concatenate([x_a, x_t, x_v], axis=-1).reshape(M, 3 * De)

    # feature-expanded keep mask, laid out as [mask_a*De | mask_t*De | mask_v*De]
    keep = (input_mask != 0).astype(jnp.float32)                 # (B, S, 3)
    mask_feat = jnp.repeat(keep, De, axis=-1).reshape(M, 3 * De)

    # lane-padded (block-diagonal) per-modality head weights
    CpH = max(128, _round_up(3 * C, 128))
    heads_w = jnp.zeros((3 * De, CpH), jnp.float32)
    heads_w = heads_w.at[0:De, 0:C].set(params["head_a_w"])
    heads_w = heads_w.at[De:2 * De, C:2 * C].set(params["head_t_w"])
    heads_w = heads_w.at[2 * De:, 2 * C:3 * C].set(params["head_v_w"])
    heads_b = jnp.zeros((1, CpH), jnp.float32)
    heads_b = heads_b.at[0, 0:C].set(params["head_a_b"])
    heads_b = heads_b.at[0, C:2 * C].set(params["head_t_b"])
    heads_b = heads_b.at[0, 2 * C:3 * C].set(params["head_v_b"])

    CpO = max(128, _round_up(C, 128))
    out_w = jnp.zeros((3 * De, CpO), jnp.float32).at[:, :C].set(params["head_w"])
    out_b = jnp.zeros((1, CpO), jnp.float32).at[0, :C].set(params["head_b"])

    out_pad, heads_pad = fused_final(
        x_feat, mask_feat,
        heads_w.astype(bf16), heads_b,
        params["proj1_w"].astype(bf16), params["proj1_b"].reshape(1, -1),
        out_w.astype(bf16), out_b,
    )

    out = out_pad[:, :C].reshape(B, S, C)
    out_a = heads_pad[:, 0:C].reshape(B, S, C)
    out_t = heads_pad[:, C:2 * C].reshape(B, S, C)
    out_v = heads_pad[:, 2 * C:3 * C].reshape(B, S, C)
    # TODO(synk): non-first-stage branch (torch.rand + autoencoder decoder) is
    # non-deterministic in the reference and not implemented.
    return {"out": out, "out_a": out_a, "out_t": out_t, "out_v": out_v}


# ----------------------------------------------------------------------------
# Deterministic parameter init (synthetic; shapes from OurModel.__init__)
# ----------------------------------------------------------------------------
def init_params(key, adim, tdim, vdim, De, n_classes, depth, mlp_ratio):
    D = 3 * De
    hidden = int(mlp_ratio * De)
    kit = iter(jax.random.split(key, 64))

    def lin(fan_in, fan_out, scale=0.02):
        w = scale * jax.random.normal(next(kit), (fan_in, fan_out), jnp.float32)
        b = 0.01 * jax.random.normal(next(kit), (fan_out,), jnp.float32)
        return w, b

    p = {}
    p["a_w"], p["a_b"] = lin(adim, De)
    p["t_w"], p["t_b"] = lin(tdim, De)
    p["v_w"], p["v_b"] = lin(vdim, De)
    layers = []
    for _ in range(depth):
        lp = {
            "ln1_g": jnp.ones((De,), jnp.float32),
            "ln1_b": jnp.zeros((De,), jnp.float32),
            "ln2_g": jnp.ones((De,), jnp.float32),
            "ln2_b": jnp.zeros((De,), jnp.float32),
        }
        lp["qkv_w"], lp["qkv_b"] = lin(De, 3 * De)
        lp["proj_w"], lp["proj_b"] = lin(De, De)
        lp["fc1_w"], lp["fc1_b"] = lin(De, hidden)
        lp["fc2_w"], lp["fc2_b"] = lin(hidden, De)
        layers.append(lp)
    p["block"] = {"layers": layers}
    p["proj1_w"], p["proj1_b"] = lin(D, D)
    p["head_a_w"], p["head_a_b"] = lin(De, n_classes)
    p["head_t_w"], p["head_t_b"] = lin(De, n_classes)
    p["head_v_w"], p["head_v_b"] = lin(De, n_classes)
    p["head_w"], p["head_b"] = lin(D, n_classes)
    return p


# ----------------------------------------------------------------------------
if __name__ == "__main__":
    adim, tdim, vdim = 10, 12, 14
    De, n_classes = 32, 4
    depth, num_heads, mlp_ratio = 2, 4, 1
    S, B = 8, 2

    key = jax.random.PRNGKey(0)
    k_in, _ = jax.random.split(key)
    inputfeats = jax.random.normal(k_in, (S, B, adim + tdim + vdim), jnp.float32)
    input_features_mask = jnp.ones((S, B, 3), jnp.float32)
    umask = jnp.ones((B, S), jnp.float32).at[1, 7].set(0.0)

    params = init_params(jax.random.PRNGKey(42), adim, tdim, vdim,
                         De, n_classes, depth, mlp_ratio)

    fwd = jax.jit(functools.partial(our_model_forward, adim=adim, tdim=tdim,
                                    vdim=vdim, num_heads=num_heads))
    out = fwd(params, inputfeats, input_features_mask, umask)
    jax.block_until_ready(out)

    assert out["out"].shape == (B, S, n_classes)
    assert out["out_a"].shape == (B, S, n_classes)
    assert out["out_t"].shape == (B, S, n_classes)
    assert out["out_v"].shape == (B, S, n_classes)
    for v in out.values():
        assert bool(jnp.all(jnp.isfinite(v)))
    print("KERNEL_OK")
</pallas_src>

<mosaic_0001>
module attributes {stable_mosaic.version = 11 : i64} {
  func.func @_in_proj_kernel(%arg0: i32, %arg1: memref<8x36xf32, #tpu.memory_space<vmem>>, %arg2: memref<36x128xbf16, #tpu.memory_space<vmem>>, %arg3: memref<1x128xf32, #tpu.memory_space<vmem>>, %arg4: memref<8x128xf32, #tpu.memory_space<vmem>>) attributes {dimension_semantics = [#tpu.dimension_semantics<parallel>], iteration_bounds = array<i64: 2>, scalar_prefetch = 0 : i64, scratch_operands = 0 : i64, tpu.core_type = #tpu.core_type<tc>, window_params = [{transform_indices = @transform_0, window_bounds = array<i64: 8, 36>}, {pipeline_mode = #tpu.pipeline_mode<synchronous>, transform_indices = @transform_1, window_bounds = array<i64: 36, 128>}, {pipeline_mode = #tpu.pipeline_mode<synchronous>, transform_indices = @transform_2, window_bounds = array<i64: 1, 128>}, {transform_indices = @transform_3, window_bounds = array<i64: 8, 128>}]} {
    %c0 = arith.constant 0 : index
    %c0_0 = arith.constant 0 : index
    %0 = vector.load %arg1[%c0, %c0_0] : memref<8x36xf32, #tpu.memory_space<vmem>>, vector<8x36xf32>
    %1 = arith.truncf %0 : vector<8x36xf32> to vector<8x36xbf16>
    %c0_1 = arith.constant 0 : index
    %c0_2 = arith.constant 0 : index
    %2 = vector.load %arg2[%c0_1, %c0_2] : memref<36x128xbf16, #tpu.memory_space<vmem>>, vector<36x128xbf16>
    %cst = arith.constant dense<0.000000e+00> : vector<8x128xf32>
    %3 = tpu.matmul %1, %2, %cst {dimension_numbers = #tpu.dot_dimension_numbers<[1], [0], [0], [1], [0, 0, 1, 1], [], []>} : vector<8x36xbf16>, vector<36x128xbf16>, vector<8x128xf32> -> vector<8x128xf32>
    %c0_3 = arith.constant 0 : index
    %c0_4 = arith.constant 0 : index
    %4 = vector.load %arg3[%c0_3, %c0_4] : memref<1x128xf32, #tpu.memory_space<vmem>>, vector<1x128xf32>
    %5 = vector.broadcast %4 : vector<1x128xf32> to vector<8x128xf32>
    %6 = arith.addf %3, %5 : vector<8x128xf32>
    %c0_5 = arith.constant 0 : index
    %c0_6 = arith.constant 0 : index
    %7 = vector.load %arg4[%c0_5, %c0_6] : memref<8x128xf32, #tpu.memory_space<vmem>>, vector<8x128xf32>
    tpu.vector_store %arg4[%c0_5, %c0_6], %6 {strides = array<i32>} : memref<8x128xf32, #tpu.memory_space<vmem>>, vector<8x128xf32>,
    return
  }
  func.func @transform_0(%arg0: i32) -> (i32, i32) {
    %c0_i32 = arith.constant 0 : i32
    %c0_i32_0 = arith.constant 0 : i32
    return %arg0, %c0_i32 : i32, i32
  }
  func.func @transform_1(%arg0: i32) -> (i32, i32) {
    %c0_i32 = arith.constant 0 : i32
    %c0_i32_0 = arith.constant 0 : i32
    %c0_i32_1 = arith.constant 0 : i32
    return %c0_i32, %c0_i32_0 : i32, i32
  }
  func.func @transform_2(%arg0: i32) -> (i32, i32) {
    %c0_i32 = arith.constant 0 : i32
    %c0_i32_0 = arith.constant 0 : i32
    %c0_i32_1 = arith.constant 0 : i32
    return %c0_i32, %c0_i32_0 : i32, i32
  }
  func.func @transform_3(%arg0: i32) -> (i32, i32) {
    %c0_i32 = arith.constant 0 : i32
    %c0_i32_0 = arith.constant 0 : i32
    return %arg0, %c0_i32 : i32, i32
  }
}

module attributes {stable_mosaic.version = 11 : i64} {
  func.func @_encoder_layer_kernel(%arg0: i32, %arg1: memref<1x8x32xf32, #tpu.memory_space<vmem>>, %arg2: memref<1x1x8xf32, #tpu.memory_space<vmem>>, %arg3: memref<1x32xf32, #tpu.memory_space<vmem>>, %arg4: memref<1x32xf32, #tpu.memory_space<vmem>>, %arg5: memref<32x96xbf16, #tpu.memory_space<vmem>>, %arg6: memref<1x96xf32, #tpu.memory_space<vmem>>, %arg7: memref<32x32xbf16, #tpu.memory_space<vmem>>, %arg8: memref<1x32xf32, #tpu.memory_space<vmem>>, %arg9: memref<1x32xf32, #tpu.memory_space<vmem>>, %arg10: memref<1x32xf32, #tpu.memory_space<vmem>>, %arg11: memref<32x32xbf16, #tpu.memory_space<vmem>>, %arg12: memref<1x32xf32, #tpu.memory_space<vmem>>, %arg13: memref<32x32xbf16, #tpu.memory_space<vmem>>, %arg14: memref<1x32xf32, #tpu.memory_space<vmem>>, %arg15: memref<1x8x32xf32, #tpu.memory_space<vmem>>) attributes {dimension_semantics = [#tpu.dimension_semantics<parallel>], iteration_bounds = array<i64: 6>, scalar_prefetch = 0 : i64, scratch_operands = 0 : i64, tpu.core_type = #tpu.core_type<tc>, window_params = [{transform_indices = @transform_0, window_bounds = array<i64: 1, 8, 32>}, {transform_indices = @transform_1, window_bounds = array<i64: 1, 1, 8>}, {pipeline_mode = #tpu.pipeline_mode<synchronous>, transform_indices = @transform_2, window_bounds = array<i64: 1, 32>}, {pipeline_mode = #tpu.pipeline_mode<synchronous>, transform_indices = @transform_3, window_bounds = array<i64: 1, 32>}, {pipeline_mode = #tpu.pipeline_mode<synchronous>, transform_indices = @transform_4, window_bounds = array<i64: 32, 96>}, {pipeline_mode = #tpu.pipeline_mode<synchronous>, transform_indices = @transform_5, window_bounds = array<i64: 1, 96>}, {pipeline_mode = #tpu.pipeline_mode<synchronous>, transform_indices = @transform_6, window_bounds = array<i64: 32, 32>}, {pipeline_mode = #tpu.pipeline_mode<synchronous>, transform_indices = @transform_7, window_bounds = array<i64: 1, 32>}, {pipeline_mode = #tpu.pipeline_mode<synchronous>, transform_indices = @transform_8, window_bounds = array<i64: 1, 32>}, {pipeline_mode = #tpu.pipeline_mode<synchronous>, transform_indices = @transform_9, window_bounds = array<i64: 1, 32>}, {pipeline_mode = #tpu.pipeline_mode<synchronous>, transform_indices = @transform_10, window_bounds = array<i64: 32, 32>}, {pipeline_mode = #tpu.pipeline_mode<synchronous>, transform_indices = @transform_11, window_bounds = array<i64: 1, 32>}, {pipeline_mode = #tpu.pipeline_mode<synchronous>, transform_indices = @transform_12, window_bounds = array<i64: 32, 32>}, {pipeline_mode = #tpu.pipeline_mode<synchronous>, transform_indices = @transform_13, window_bounds = array<i64: 1, 32>}, {transform_indices = @transform_14, window_bounds = array<i64: 1, 8, 32>}]} {
    %c0 = arith.constant 0 : index
    %c0_0 = arith.constant 0 : index
    %c0_1 = arith.constant 0 : index
    %0 = vector.load %arg1[%c0, %c0_0, %c0_1] : memref<1x8x32xf32, #tpu.memory_space<vmem>>, vector<1x8x32xf32>
    %1 = vector.shape_cast %0 : vector<1x8x32xf32> to vector<8x32xf32>
    %c0_2 = arith.constant 0 : index
    %c0_3 = arith.constant 0 : index
    %2 = vector.load %arg3[%c0_2, %c0_3] : memref<1x32xf32, #tpu.memory_space<vmem>>, vector<1x32xf32>
    %c0_4 = arith.constant 0 : index
    %c0_5 = arith.constant 0 : index
    %3 = vector.load %arg4[%c0_4, %c0_5] : memref<1x32xf32, #tpu.memory_space<vmem>>, vector<1x32xf32>
    %cst = arith.constant dense<0.000000e+00> : vector<8xf32>
    %4 = vector.multi_reduction <add>, %1, %cst [1] : vector<8x32xf32> to vector<8xf32>
    %5 = vector.shape_cast %4 : vector<8xf32> to vector<8x1xf32>
    %cst_6 = arith.constant 3.200000e+01 : f32
    %6 = vector.broadcast %cst_6 : f32 to vector<8x1xf32>
    %7 = arith.divf %5, %6 : vector<8x1xf32>
    %8 = vector.broadcast %7 : vector<8x1xf32> to vector<8x32xf32>
    %9 = arith.subf %1, %8 : vector<8x32xf32>
    %10 = arith.mulf %9, %9 : vector<8x32xf32>
    %cst_7 = arith.constant dense<0.000000e+00> : vector<8xf32>
    %11 = vector.multi_reduction <add>, %10, %cst_7 [1] : vector<8x32xf32> to vector<8xf32>
    %12 = vector.shape_cast %11 : vector<8xf32> to vector<8x1xf32>
    %cst_8 = arith.constant 3.200000e+01 : f32
    %13 = vector.broadcast %cst_8 : f32 to vector<8x1xf32>
    %14 = arith.divf %12, %13 : vector<8x1xf32>
    %cst_9 = arith.constant 9.99999974E-6 : f32
    %15 = vector.broadcast %cst_9 : f32 to vector<8x1xf32>
    %16 = arith.addf %14, %15 : vector<8x1xf32>
    %17 = math.rsqrt %16 : vector<8x1xf32>
    %18 = vector.broadcast %17 : vector<8x1xf32> to vector<8x32xf32>
    %19 = arith.mulf %9, %18 : vector<8x32xf32>
    %20 = vector.broadcast %2 : vector<1x32xf32> to vector<8x32xf32>
    %21 = arith.mulf %19, %20 : vector<8x32xf32>
    %22 = vector.broadcast %3 : vector<1x32xf32> to vector<8x32xf32>
    %23 = arith.addf %21, %22 : vector<8x32xf32>
    %24 = arith.truncf %23 : vector<8x32xf32> to vector<8x32xbf16>
    %c0_10 = arith.constant 0 : index
    %c0_11 = arith.constant 0 : index
    %25 = vector.load %arg5[%c0_10, %c0_11] : memref<32x96xbf16, #tpu.memory_space<vmem>>, vector<32x96xbf16>
    %cst_12 = arith.constant dense<0.000000e+00> : vector<8x96xf32>
    %26 = tpu.matmul %24, %25, %cst_12 {dimension_numbers = #tpu.dot_dimension_numbers<[1], [0], [0], [1], [0, 0, 1, 1], [], []>} : vector<8x32xbf16>, vector<32x96xbf16>, vector<8x96xf32> -> vector<8x96xf32>
    %c0_13 = arith.constant 0 : index
    %c0_14 = arith.constant 0 : index
    %27 = vector.load %arg6[%c0_13, %c0_14] : memref<1x96xf32, #tpu.memory_space<vmem>>, vector<1x96xf32>
    %28 = vector.broadcast %27 : vector<1x96xf32> to vector<8x96xf32>
    %29 = arith.addf %26, %28 : vector<8x96xf32>
    %c0_15 = arith.constant 0 : index
    %c0_16 = arith.constant 0 : index
    %c0_17 = arith.constant 0 : index
    %30 = vector.load %arg2[%c0_15, %c0_16, %c0_17] : memref<1x1x8xf32, #tpu.memory_space<vmem>>, vector<1x1x8xf32>
    %31 = vector.shape_cast %30 : vector<1x1x8xf32> to vector<1x8xf32>
    %cst_18 = arith.constant 0.000000e+00 : f32
    %32 = vector.broadcast %cst_18 : f32 to vector<1x8xf32>
    %33 = arith.cmpf ogt, %31, %32 : vector<1x8xf32>
    %cst_19 = arith.constant 0.000000e+00 : f32
    %cst_20 = arith.constant -1.000000e+09 : f32
    %34 = vector.broadcast %cst_19 : f32 to vector<1x8xf32>
    %35 = vector.broadcast %cst_20 : f32 to vector<1x8xf32>
    %36 = arith.select %33, %34, %35 : vector<1x8xi1>, vector<1x8xf32>
    %37 = vector.extract_strided_slice %29 {offsets = [0, 0], sizes = [8, 8], strides = [1, 1]} : vector<8x96xf32> to vector<8x8xf32>
    %38 = arith.truncf %37 : vector<8x8xf32> to vector<8x8xbf16>
    %39 = vector.extract_strided_slice %29 {offsets = [0, 32], sizes = [8, 8], strides = [1, 1]} : vector<8x96xf32> to vector<8x8xf32>
    %40 = arith.truncf %39 : vector<8x8xf32> to vector<8x8xbf16>
    %41 = vector.extract_strided_slice %29 {offsets = [0, 64], sizes = [8, 8], strides = [1, 1]} : vector<8x96xf32> to vector<8x8xf32>
    %42 = arith.truncf %41 : vector<8x8xf32> to vector<8x8xbf16>
    %cst_21 = arith.constant dense<0.000000e+00> : vector<8x8xf32>
    %43 = tpu.matmul %38, %40, %cst_21 {dimension_numbers = #tpu.dot_dimension_numbers<[1], [1], [0], [0], [0, 0, 1, 0], [], []>} : vector<8x8xbf16>, vector<8x8xbf16>, vector<8x8xf32> -> vector<8x8xf32>
    %cst_22 = arith.constant 0.353553385 : f32
    %44 = vector.broadcast %cst_22 : f32 to vector<8x8xf32>
    %45 = arith.mulf %43, %44 : vector<8x8xf32>
    %46 = vector.broadcast %36 : vector<1x8xf32> to vector<8x8xf32>
    %47 = arith.addf %45, %46 : vector<8x8xf32>
    %cst_23 = arith.constant dense<0xFF800000> : vector<8xf32>
    %48 = vector.multi_reduction <maximumf>, %47, %cst_23 [1] : vector<8x8xf32> to vector<8xf32>
    %49 = vector.shape_cast %48 : vector<8xf32> to vector<8x1xf32>
    %50 = vector.broadcast %49 : vector<8x1xf32> to vector<8x8xf32>
    %51 = arith.subf %47, %50 : vector<8x8xf32>
    %52 = math.exp %51 : vector<8x8xf32>
    %cst_24 = arith.constant dense<0.000000e+00> : vector<8xf32>
    %53 = vector.multi_reduction <add>, %52, %cst_24 [1] : vector<8x8xf32> to vector<8xf32>
    %54 = vector.shape_cast %53 : vector<8xf32> to vector<8x1xf32>
    %55 = tpu.reciprocal %54 {approx = true} : vector<8x1xf32> -> vector<8x1xf32>
    %56 = vector.broadcast %55 : vector<8x1xf32> to vector<8x8xf32>
    %57 = arith.mulf %52, %56 : vector<8x8xf32>
    %58 = arith.truncf %57 : vector<8x8xf32> to vector<8x8xbf16>
    %cst_25 = arith.constant dense<0.000000e+00> : vector<8x8xf32>
    %59 = tpu.matmul %58, %42, %cst_25 {dimension_numbers = #tpu.dot_dimension_numbers<[1], [0], [0], [1], [0, 0, 1, 1], [], []>} : vector<8x8xbf16>, vector<8x8xbf16>, vector<8x8xf32> -> vector<8x8xf32>
    %60 = vector.extract_strided_slice %29 {offsets = [0, 8], sizes = [8, 8], strides = [1, 1]} : vector<8x96xf32> to vector<8x8xf32>
    %61 = arith.truncf %60 : vector<8x8xf32> to vector<8x8xbf16>
    %62 = vector.extract_strided_slice %29 {offsets = [0, 40], sizes = [8, 8], strides = [1, 1]} : vector<8x96xf32> to vector<8x8xf32>
    %63 = arith.truncf %62 : vector<8x8xf32> to vector<8x8xbf16>
    %64 = vector.extract_strided_slice %29 {offsets = [0, 72], sizes = [8, 8], strides = [1, 1]} : vector<8x96xf32> to vector<8x8xf32>
    %65 = arith.truncf %64 : vector<8x8xf32> to vector<8x8xbf16>
    %cst_26 = arith.constant dense<0.000000e+00> : vector<8x8xf32>
    %66 = tpu.matmul %61, %63, %cst_26 {dimension_numbers = #tpu.dot_dimension_numbers<[1], [1], [0], [0], [0, 0, 1, 0], [], []>} : vector<8x8xbf16>, vector<8x8xbf16>, vector<8x8xf32> -> vector<8x8xf32>
    %cst_27 = arith.constant 0.353553385 : f32
    %67 = vector.broadcast %cst_27 : f32 to vector<8x8xf32>
    %68 = arith.mulf %66, %67 : vector<8x8xf32>
    %69 = vector.broadcast %36 : vector<1x8xf32> to vector<8x8xf32>
    %70 = arith.addf %68, %69 : vector<8x8xf32>
    %cst_28 = arith.constant dense<0xFF800000> : vector<8xf32>
    %71 = vector.multi_reduction <maximumf>, %70, %cst_28 [1] : vector<8x8xf32> to vector<8xf32>
    %72 = vector.shape_cast %71 : vector<8xf32> to vector<8x1xf32>
    %73 = vector.broadcast %72 : vector<8x1xf32> to vector<8x8xf32>
    %74 = arith.subf %70, %73 : vector<8x8xf32>
    %75 = math.exp %74 : vector<8x8xf32>
    %cst_29 = arith.constant dense<0.000000e+00> : vector<8xf32>
    %76 = vector.multi_reduction <add>, %75, %cst_29 [1] : vector<8x8xf32> to vector<8xf32>
    %77 = vector.shape_cast %76 : vector<8xf32> to vector<8x1xf32>
    %78 = tpu.reciprocal %77 {approx = true} : vector<8x1xf32> -> vector<8x1xf32>
    %79 = vector.broadcast %78 : vector<8x1xf32> to vector<8x8xf32>
    %80 = arith.mulf %75, %79 : vector<8x8xf32>
    %81 = arith.truncf %80 : vector<8x8xf32> to vector<8x8xbf16>
    %cst_30 = arith.constant dense<0.000000e+00> : vector<8x8xf32>
    %82 = tpu.matmul %81, %65, %cst_30 {dimension_numbers = #tpu.dot_dimension_numbers<[1], [0], [0], [1], [0, 0, 1, 1], [], []>} : vector<8x8xbf16>, vector<8x8xbf16>, vector<8x8xf32> -> vector<8x8xf32>
    %83 = vector.extract_strided_slice %29 {offsets = [0, 16], sizes = [8, 8], strides = [1, 1]} : vector<8x96xf32> to vector<8x8xf32>
    %84 = arith.truncf %83 : vector<8x8xf32> to vector<8x8xbf16>
    %85 = vector.extract_strided_slice %29 {offsets = [0, 48], sizes = [8, 8], strides = [1, 1]} : vector<8x96xf32> to vector<8x8xf32>
    %86 = arith.truncf %85 : vector<8x8xf32> to vector<8x8xbf16>
    %87 = vector.extract_strided_slice %29 {offsets = [0, 80], sizes = [8, 8], strides = [1, 1]} : vector<8x96xf32> to vector<8x8xf32>
    %88 = arith.truncf %87 : vector<8x8xf32> to vector<8x8xbf16>
    %cst_31 = arith.constant dense<0.000000e+00> : vector<8x8xf32>
    %89 = tpu.matmul %84, %86, %cst_31 {dimension_numbers = #tpu.dot_dimension_numbers<[1], [1], [0], [0], [0, 0, 1, 0], [], []>} : vector<8x8xbf16>, vector<8x8xbf16>, vector<8x8xf32> -> vector<8x8xf32>
    %cst_32 = arith.constant 0.353553385 : f32
    %90 = vector.broadcast %cst_32 : f32 to vector<8x8xf32>
    %91 = arith.mulf %89, %90 : vector<8x8xf32>
    %92 = vector.broadcast %36 : vector<1x8xf32> to vector<8x8xf32>
    %93 = arith.addf %91, %92 : vector<8x8xf32>
    %cst_33 = arith.constant dense<0xFF800000> : vector<8xf32>
    %94 = vector.multi_reduction <maximumf>, %93, %cst_33 [1] : vector<8x8xf32> to vector<8xf32>
    %95 = vector.shape_cast %94 : vector<8xf32> to vector<8x1xf32>
    %96 = vector.broadcast %95 : vector<8x1xf32> to vector<8x8xf32>
    %97 = arith.subf %93, %96 : vector<8x8xf32>
    %98 = math.exp %97 : vector<8x8xf32>
    %cst_34 = arith.constant dense<0.000000e+00> : vector<8xf32>
    %99 = vector.multi_reduction <add>, %98, %cst_34 [1] : vector<8x8xf32> to vector<8xf32>
    %100 = vector.shape_cast %99 : vector<8xf32> to vector<8x1xf32>
    %101 = tpu.reciprocal %100 {approx = true} : vector<8x1xf32> -> vector<8x1xf32>
    %102 = vector.broadcast %101 : vector<8x1xf32> to vector<8x8xf32>
    %103 = arith.mulf %98, %102 : vector<8x8xf32>
    %104 = arith.truncf %103 : vector<8x8xf32> to vector<8x8xbf16>
    %cst_35 = arith.constant dense<0.000000e+00> : vector<8x8xf32>
    %105 = tpu.matmul %104, %88, %cst_35 {dimension_numbers = #tpu.dot_dimension_numbers<[1], [0], [0], [1], [0, 0, 1, 1], [], []>} : vector<8x8xbf16>, vector<8x8xbf16>, vector<8x8xf32> -> vector<8x8xf32>
    %106 = vector.extract_strided_slice %29 {offsets = [0, 24], sizes = [8, 8], strides = [1, 1]} : vector<8x96xf32> to vector<8x8xf32>
    %107 = arith.truncf %106 : vector<8x8xf32> to vector<8x8xbf16>
    %108 = vector.extract_strided_slice %29 {offsets = [0, 56], sizes = [8, 8], strides = [1, 1]} : vector<8x96xf32> to vector<8x8xf32>
    %109 = arith.truncf %108 : vector<8x8xf32> to vector<8x8xbf16>
    %110 = vector.extract_strided_slice %29 {offsets = [0, 88], sizes = [8, 8], strides = [1, 1]} : vector<8x96xf32> to vector<8x8xf32>
    %111 = arith.truncf %110 : vector<8x8xf32> to vector<8x8xbf16>
    %cst_36 = arith.constant dense<0.000000e+00> : vector<8x8xf32>
    %112 = tpu.matmul %107, %109, %cst_36 {dimension_numbers = #tpu.dot_dimension_numbers<[1], [1], [0], [0], [0, 0, 1, 0], [], []>} : vector<8x8xbf16>, vector<8x8xbf16>, vector<8x8xf32> -> vector<8x8xf32>
    %cst_37 = arith.constant 0.353553385 : f32
    %113 = vector.broadcast %cst_37 : f32 to vector<8x8xf32>
    %114 = arith.mulf %112, %113 : vector<8x8xf32>
    %115 = vector.broadcast %36 : vector<1x8xf32> to vector<8x8xf32>
    %116 = arith.addf %114, %115 : vector<8x8xf32>
    %cst_38 = arith.constant dense<0xFF800000> : vector<8xf32>
    %117 = vector.multi_reduction <maximumf>, %116, %cst_38 [1] : vector<8x8xf32> to vector<8xf32>
    %118 = vector.shape_cast %117 : vector<8xf32> to vector<8x1xf32>
    %119 = vector.broadcast %118 : vector<8x1xf32> to vector<8x8xf32>
    %120 = arith.subf %116, %119 : vector<8x8xf32>
    %121 = math.exp %120 : vector<8x8xf32>
    %cst_39 = arith.constant dense<0.000000e+00> : vector<8xf32>
    %122 = vector.multi_reduction <add>, %121, %cst_39 [1] : vector<8x8xf32> to vector<8xf32>
    %123 = vector.shape_cast %122 : vector<8xf32> to vector<8x1xf32>
    %124 = tpu.reciprocal %123 {approx = true} : vector<8x1xf32> -> vector<8x1xf32>
    %125 = vector.broadcast %124 : vector<8x1xf32> to vector<8x8xf32>
    %126 = arith.mulf %121, %125 : vector<8x8xf32>
    %127 = arith.truncf %126 : vector<8x8xf32> to vector<8x8xbf16>
    %cst_40 = arith.constant dense<0.000000e+00> : vector<8x8xf32>
    %128 = tpu.matmul %127, %111, %cst_40 {dimension_numbers = #tpu.dot_dimension_numbers<[1], [0], [0], [1], [0, 0, 1, 1], [], []>} : vector<8x8xbf16>, vector<8x8xbf16>, vector<8x8xf32> -> vector<8x8xf32>
    %129 = tpu.concatenate %59, %82, %105, %128 in 1 : vector<8x8xf32>, vector<8x8xf32>, vector<8x8xf32>, vector<8x8xf32> -> vector<8x32xf32>
    %130 = arith.truncf %129 : vector<8x32xf32> to vector<8x32xbf16>
    %c0_41 = arith.constant 0 : index
    %c0_42 = arith.constant 0 : index
    %131 = vector.load %arg7[%c0_41, %c0_42] : memref<32x32xbf16, #tpu.memory_space<vmem>>, vector<32x32xbf16>
    %cst_43 = arith.constant dense<0.000000e+00> : vector<8x32xf32>
    %132 = tpu.matmul %130, %131, %cst_43 {dimension_numbers = #tpu.dot_dimension_numbers<[1], [0], [0], [1], [0, 0, 1, 1], [], []>} : vector<8x32xbf16>, vector<32x32xbf16>, vector<8x32xf32> -> vector<8x32xf32>
    %c0_44 = arith.constant 0 : index
    %c0_45 = arith.constant 0 : index
    %133 = vector.load %arg8[%c0_44, %c0_45] : memref<1x32xf32, #tpu.memory_space<vmem>>, vector<1x32xf32>
    %134 = vector.broadcast %133 : vector<1x32xf32> to vector<8x32xf32>
    %135 = arith.addf %132, %134 : vector<8x32xf32>
    %136 = arith.addf %1, %135 : vector<8x32xf32>
    %c0_46 = arith.constant 0 : index
    %c0_47 = arith.constant 0 : index
    %137 = vector.load %arg9[%c0_46, %c0_47] : memref<1x32xf32, #tpu.memory_space<vmem>>, vector<1x32xf32>
    %c0_48 = arith.constant 0 : index
    %c0_49 = arith.constant 0 : index
    %138 = vector.load %arg10[%c0_48, %c0_49] : memref<1x32xf32, #tpu.memory_space<vmem>>, vector<1x32xf32>
    %cst_50 = arith.constant dense<0.000000e+00> : vector<8xf32>
    %139 = vector.multi_reduction <add>, %136, %cst_50 [1] : vector<8x32xf32> to vector<8xf32>
    %140 = vector.shape_cast %139 : vector<8xf32> to vector<8x1xf32>
    %cst_51 = arith.constant 3.200000e+01 : f32
    %141 = vector.broadcast %cst_51 : f32 to vector<8x1xf32>
    %142 = arith.divf %140, %141 : vector<8x1xf32>
    %143 = vector.broadcast %142 : vector<8x1xf32> to vector<8x32xf32>
    %144 = arith.subf %136, %143 : vector<8x32xf32>
    %145 = arith.mulf %144, %144 : vector<8x32xf32>
    %cst_52 = arith.constant dense<0.000000e+00> : vector<8xf32>
    %146 = vector.multi_reduction <add>, %145, %cst_52 [1] : vector<8x32xf32> to vector<8xf32>
    %147 = vector.shape_cast %146 : vector<8xf32> to vector<8x1xf32>
    %cst_53 = arith.constant 3.200000e+01 : f32
    %148 = vector.broadcast %cst_53 : f32 to vector<8x1xf32>
    %149 = arith.divf %147, %148 : vector<8x1xf32>
    %cst_54 = arith.constant 9.99999974E-6 : f32
    %150 = vector.broadcast %cst_54 : f32 to vector<8x1xf32>
    %151 = arith.addf %149, %150 : vector<8x1xf32>
    %152 = math.rsqrt %151 : vector<8x1xf32>
    %153 = vector.broadcast %152 : vector<8x1xf32> to vector<8x32xf32>
    %154 = arith.mulf %144, %153 : vector<8x32xf32>
    %155 = vector.broadcast %137 : vector<1x32xf32> to vector<8x32xf32>
    %156 = arith.mulf %154, %155 : vector<8x32xf32>
    %157 = vector.broadcast %138 : vector<1x32xf32> to vector<8x32xf32>
    %158 = arith.addf %156, %157 : vector<8x32xf32>
    %159 = arith.truncf %158 : vector<8x32xf32> to vector<8x32xbf16>
    %c0_55 = arith.constant 0 : index
    %c0_56 = arith.constant 0 : index
    %160 = vector.load %arg11[%c0_55, %c0_56] : memref<32x32xbf16, #tpu.memory_space<vmem>>, vector<32x32xbf16>
    %cst_57 = arith.constant dense<0.000000e+00> : vector<8x32xf32>
    %161 = tpu.matmul %159, %160, %cst_57 {dimension_numbers = #tpu.dot_dimension_numbers<[1], [0], [0], [1], [0, 0, 1, 1], [], []>} : vector<8x32xbf16>, vector<32x32xbf16>, vector<8x32xf32> -> vector<8x32xf32>
    %c0_58 = arith.constant 0 : index
    %c0_59 = arith.constant 0 : index
    %162 = vector.load %arg12[%c0_58, %c0_59] : memref<1x32xf32, #tpu.memory_space<vmem>>, vector<1x32xf32>
    %163 = vector.broadcast %162 : vector<1x32xf32> to vector<8x32xf32>
    %164 = arith.addf %161, %163 : vector<8x32xf32>
    %165 = arith.mulf %164, %164 : vector<8x32xf32>
    %166 = arith.mulf %164, %165 : vector<8x32xf32>
    %cst_60 = arith.constant 4.471500e-02 : f32
    %167 = vector.broadcast %cst_60 : f32 to vector<8x32xf32>
    %168 = arith.mulf %167, %166 : vector<8x32xf32>
    %169 = arith.addf %164, %168 : vector<8x32xf32>
    %cst_61 = arith.constant 0.797884583 : f32
    %170 = vector.broadcast %cst_61 : f32 to vector<8x32xf32>
    %171 = arith.mulf %170, %169 : vector<8x32xf32>
    %172 = math.tanh %171 : vector<8x32xf32>
    %cst_62 = arith.constant 1.000000e+00 : f32
    %173 = vector.broadcast %cst_62 : f32 to vector<8x32xf32>
    %174 = arith.addf %173, %172 : vector<8x32xf32>
    %cst_63 = arith.constant 5.000000e-01 : f32
    %175 = vector.broadcast %cst_63 : f32 to vector<8x32xf32>
    %176 = arith.mulf %175, %174 : vector<8x32xf32>
    %177 = arith.mulf %164, %176 : vector<8x32xf32>
    %178 = arith.truncf %177 : vector<8x32xf32> to vector<8x32xbf16>
    %c0_64 = arith.constant 0 : index
    %c0_65 = arith.constant 0 : index
    %179 = vector.load %arg13[%c0_64, %c0_65] : memref<32x32xbf16, #tpu.memory_space<vmem>>, vector<32x32xbf16>
    %cst_66 = arith.constant dense<0.000000e+00> : vector<8x32xf32>
    %180 = tpu.matmul %178, %179, %cst_66 {dimension_numbers = #tpu.dot_dimension_numbers<[1], [0], [0], [1], [0, 0, 1, 1], [], []>} : vector<8x32xbf16>, vector<32x32xbf16>, vector<8x32xf32> -> vector<8x32xf32>
    %c0_67 = arith.constant 0 : index
    %c0_68 = arith.constant 0 : index
    %181 = vector.load %arg14[%c0_67, %c0_68] : memref<1x32xf32, #tpu.memory_space<vmem>>, vector<1x32xf32>
    %182 = vector.broadcast %181 : vector<1x32xf32> to vector<8x32xf32>
    %183 = arith.addf %180, %182 : vector<8x32xf32>
    %184 = arith.addf %136, %183 : vector<8x32xf32>
    %c0_69 = arith.constant 0 : index
    %c0_70 = arith.constant 0 : index
    %c0_71 = arith.constant 0 : index
    %185 = vector.load %arg15[%c0_69, %c0_70, %c0_71] : memref<1x8x32xf32, #tpu.memory_space<vmem>>, vector<1x8x32xf32>
    %186 = vector.shape_cast %185 : vector<1x8x32xf32> to vector<8x32xf32>
    %187 = vector.shape_cast %184 : vector<8x32xf32> to vector<1x8x32xf32>
    tpu.vector_store %arg15[%c0_69, %c0_70, %c0_71], %187 {strides = array<i32>} : memref<1x8x32xf32, #tpu.memory_space<vmem>>, vector<1x8x32xf32>,
    return
  }
  func.func @transform_0(%arg0: i32) -> (i32, i32, i32) {
    %c0_i32 = arith.constant 0 : i32
    %c0_i32_0 = arith.constant 0 : i32
    %c0_i32_1 = arith.constant 0 : i32
    return %arg0, %c0_i32, %c0_i32_0 : i32, i32, i32
  }
  func.func @transform_1(%arg0: i32) -> (i32, i32, i32) {
    %c0_i32 = arith.constant 0 : i32
    %c0_i32_0 = arith.constant 0 : i32
    %c0_i32_1 = arith.constant 0 : i32
    return %arg0, %c0_i32, %c0_i32_0 : i32, i32, i32
  }
  func.func @transform_2(%arg0: i32) -> (i32, i32) {
    %c0_i32 = arith.constant 0 : i32
    %c0_i32_0 = arith.constant 0 : i32
    %c0_i32_1 = arith.constant 0 : i32
    return %c0_i32, %c0_i32_0 : i32, i32
  }
  func.func @transform_3(%arg0: i32) -> (i32, i32) {
    %c0_i32 = arith.constant 0 : i32
    %c0_i32_0 = arith.constant 0 : i32
    %c0_i32_1 = arith.constant 0 : i32
    return %c0_i32, %c0_i32_0 : i32, i32
  }
  func.func @transform_4(%arg0: i32) -> (i32, i32) {
    %c0_i32 = arith.constant 0 : i32
    %c0_i32_0 = arith.constant 0 : i32
    %c0_i32_1 = arith.constant 0 : i32
    return %c0_i32, %c0_i32_0 : i32, i32
  }
  func.func @transform_5(%arg0: i32) -> (i32, i32) {
    %c0_i32 = arith.constant 0 : i32
    %c0_i32_0 = arith.constant 0 : i32
    %c0_i32_1 = arith.constant 0 : i32
    return %c0_i32, %c0_i32_0 : i32, i32
  }
  func.func @transform_6(%arg0: i32) -> (i32, i32) {
    %c0_i32 = arith.constant 0 : i32
    %c0_i32_0 = arith.constant 0 : i32
    %c0_i32_1 = arith.constant 0 : i32
    return %c0_i32, %c0_i32_0 : i32, i32
  }
  func.func @transform_7(%arg0: i32) -> (i32, i32) {
    %c0_i32 = arith.constant 0 : i32
    %c0_i32_0 = arith.constant 0 : i32
    %c0_i32_1 = arith.constant 0 : i32
    return %c0_i32, %c0_i32_0 : i32, i32
  }
  func.func @transform_8(%arg0: i32) -> (i32, i32) {
    %c0_i32 = arith.constant 0 : i32
    %c0_i32_0 = arith.constant 0 : i32
    %c0_i32_1 = arith.constant 0 : i32
    return %c0_i32, %c0_i32_0 : i32, i32
  }
  func.func @transform_9(%arg0: i32) -> (i32, i32) {
    %c0_i32 = arith.constant 0 : i32
    %c0_i32_0 = arith.constant 0 : i32
    %c0_i32_1 = arith.constant 0 : i32
    return %c0_i32, %c0_i32_0 : i32, i32
  }
  func.func @transform_10(%arg0: i32) -> (i32, i32) {
    %c0_i32 = arith.constant 0 : i32
    %c0_i32_0 = arith.constant 0 : i32
    %c0_i32_1 = arith.constant 0 : i32
    return %c0_i32, %c0_i32_0 : i32, i32
  }
  func.func @transform_11(%arg0: i32) -> (i32, i32) {
    %c0_i32 = arith.constant 0 : i32
    %c0_i32_0 = arith.constant 0 : i32
    %c0_i32_1 = arith.constant 0 : i32
    return %c0_i32, %c0_i32_0 : i32, i32
  }
  func.func @transform_12(%arg0: i32) -> (i32, i32) {
    %c0_i32 = arith.constant 0 : i32
    %c0_i32_0 = arith.constant 0 : i32
    %c0_i32_1 = arith.constant 0 : i32
    return %c0_i32, %c0_i32_0 : i32, i32
  }
  func.func @transform_13(%arg0: i32) -> (i32, i32) {
    %c0_i32 = arith.constant 0 : i32
    %c0_i32_0 = arith.constant 0 : i32
    %c0_i32_1 = arith.constant 0 : i32
    return %c0_i32, %c0_i32_0 : i32, i32
  }
  func.func @transform_14(%arg0: i32) -> (i32, i32, i32) {
    %c0_i32 = arith.constant 0 : i32
    %c0_i32_0 = arith.constant 0 : i32
    %c0_i32_1 = arith.constant 0 : i32
    return %arg0, %c0_i32, %c0_i32_0 : i32, i32, i32
  }
}

module attributes {stable_mosaic.version = 11 : i64} {
  func.func @_final_kernel(%arg0: i32, %arg1: memref<8x96xf32, #tpu.memory_space<vmem>>, %arg2: memref<8x96xf32, #tpu.memory_space<vmem>>, %arg3: memref<96x128xbf16, #tpu.memory_space<vmem>>, %arg4: memref<1x128xf32, #tpu.memory_space<vmem>>, %arg5: memref<96x96xbf16, #tpu.memory_space<vmem>>, %arg6: memref<1x96xf32, #tpu.memory_space<vmem>>, %arg7: memref<96x128xbf16, #tpu.memory_space<vmem>>, %arg8: memref<1x128xf32, #tpu.memory_space<vmem>>, %arg9: memref<8x128xf32, #tpu.memory_space<vmem>>, %arg10: memref<8x128xf32, #tpu.memory_space<vmem>>) attributes {dimension_semantics = [#tpu.dimension_semantics<parallel>], iteration_bounds = array<i64: 2>, scalar_prefetch = 0 : i64, scratch_operands = 0 : i64, tpu.core_type = #tpu.core_type<tc>, window_params = [{transform_indices = @transform_0, window_bounds = array<i64: 8, 96>}, {transform_indices = @transform_1, window_bounds = array<i64: 8, 96>}, {pipeline_mode = #tpu.pipeline_mode<synchronous>, transform_indices = @transform_2, window_bounds = array<i64: 96, 128>}, {pipeline_mode = #tpu.pipeline_mode<synchronous>, transform_indices = @transform_3, window_bounds = array<i64: 1, 128>}, {pipeline_mode = #tpu.pipeline_mode<synchronous>, transform_indices = @transform_4, window_bounds = array<i64: 96, 96>}, {pipeline_mode = #tpu.pipeline_mode<synchronous>, transform_indices = @transform_5, window_bounds = array<i64: 1, 96>}, {pipeline_mode = #tpu.pipeline_mode<synchronous>, transform_indices = @transform_6, window_bounds = array<i64: 96, 128>}, {pipeline_mode = #tpu.pipeline_mode<synchronous>, transform_indices = @transform_7, window_bounds = array<i64: 1, 128>}, {transform_indices = @transform_8, window_bounds = array<i64: 8, 128>}, {transform_indices = @transform_9, window_bounds = array<i64: 8, 128>}]} {
    %c0 = arith.constant 0 : index
    %c0_0 = arith.constant 0 : index
    %0 = vector.load %arg1[%c0, %c0_0] : memref<8x96xf32, #tpu.memory_space<vmem>>, vector<8x96xf32>
    %1 = arith.truncf %0 : vector<8x96xf32> to vector<8x96xbf16>
    %c0_1 = arith.constant 0 : index
    %c0_2 = arith.constant 0 : index
    %2 = vector.load %arg3[%c0_1, %c0_2] : memref<96x128xbf16, #tpu.memory_space<vmem>>, vector<96x128xbf16>
    %cst = arith.constant dense<0.000000e+00> : vector<8x128xf32>
    %3 = tpu.matmul %1, %2, %cst {dimension_numbers = #tpu.dot_dimension_numbers<[1], [0], [0], [1], [0, 0, 1, 1], [], []>} : vector<8x96xbf16>, vector<96x128xbf16>, vector<8x128xf32> -> vector<8x128xf32>
    %c0_3 = arith.constant 0 : index
    %c0_4 = arith.constant 0 : index
    %4 = vector.load %arg4[%c0_3, %c0_4] : memref<1x128xf32, #tpu.memory_space<vmem>>, vector<1x128xf32>
    %5 = vector.broadcast %4 : vector<1x128xf32> to vector<8x128xf32>
    %6 = arith.addf %3, %5 : vector<8x128xf32>
    %c0_5 = arith.constant 0 : index
    %c0_6 = arith.constant 0 : index
    %7 = vector.load %arg10[%c0_5, %c0_6] : memref<8x128xf32, #tpu.memory_space<vmem>>, vector<8x128xf32>
    tpu.vector_store %arg10[%c0_5, %c0_6], %6 {strides = array<i32>} : memref<8x128xf32, #tpu.memory_space<vmem>>, vector<8x128xf32>,
    %c0_7 = arith.constant 0 : index
    %c0_8 = arith.constant 0 : index
    %8 = vector.load %arg2[%c0_7, %c0_8] : memref<8x96xf32, #tpu.memory_space<vmem>>, vector<8x96xf32>
    %9 = arith.mulf %0, %8 : vector<8x96xf32>
    %10 = arith.truncf %9 : vector<8x96xf32> to vector<8x96xbf16>
    %c0_9 = arith.constant 0 : index
    %c0_10 = arith.constant 0 : index
    %11 = vector.load %arg5[%c0_9, %c0_10] : memref<96x96xbf16, #tpu.memory_space<vmem>>, vector<96x96xbf16>
    %cst_11 = arith.constant dense<0.000000e+00> : vector<8x96xf32>
    %12 = tpu.matmul %10, %11, %cst_11 {dimension_numbers = #tpu.dot_dimension_numbers<[1], [0], [0], [1], [0, 0, 1, 1], [], []>} : vector<8x96xbf16>, vector<96x96xbf16>, vector<8x96xf32> -> vector<8x96xf32>
    %c0_12 = arith.constant 0 : index
    %c0_13 = arith.constant 0 : index
    %13 = vector.load %arg6[%c0_12, %c0_13] : memref<1x96xf32, #tpu.memory_space<vmem>>, vector<1x96xf32>
    %14 = vector.broadcast %13 : vector<1x96xf32> to vector<8x96xf32>
    %15 = arith.addf %12, %14 : vector<8x96xf32>
    %cst_14 = arith.constant 0.000000e+00 : f32
    %16 = vector.broadcast %cst_14 : f32 to vector<8x96xf32>
    %17 = arith.maximumf %15, %16 : vector<8x96xf32>
    %18 = arith.addf %17, %9 : vector<8x96xf32>
    %19 = arith.truncf %18 : vector<8x96xf32> to vector<8x96xbf16>
    %c0_15 = arith.constant 0 : index
    %c0_16 = arith.constant 0 : index
    %20 = vector.load %arg7[%c0_15, %c0_16] : memref<96x128xbf16, #tpu.memory_space<vmem>>, vector<96x128xbf16>
    %cst_17 = arith.constant dense<0.000000e+00> : vector<8x128xf32>
    %21 = tpu.matmul %19, %20, %cst_17 {dimension_numbers = #tpu.dot_dimension_numbers<[1], [0], [0], [1], [0, 0, 1, 1], [], []>} : vector<8x96xbf16>, vector<96x128xbf16>, vector<8x128xf32> -> vector<8x128xf32>
    %c0_18 = arith.constant 0 : index
    %c0_19 = arith.constant 0 : index
    %22 = vector.load %arg8[%c0_18, %c0_19] : memref<1x128xf32, #tpu.memory_space<vmem>>, vector<1x128xf32>
    %23 = vector.broadcast %22 : vector<1x128xf32> to vector<8x128xf32>
    %24 = arith.addf %21, %23 : vector<8x128xf32>
    %c0_20 = arith.constant 0 : index
    %c0_21 = arith.constant 0 : index
    %25 = vector.load %arg9[%c0_20, %c0_21] : memref<8x128xf32, #tpu.memory_space<vmem>>, vector<8x128xf32>
    tpu.vector_store %arg9[%c0_20, %c0_21], %24 {strides = array<i32>} : memref<8x128xf32, #tpu.memory_space<vmem>>, vector<8x128xf32>,
    return
  }
  func.func @transform_0(%arg0: i32) -> (i32, i32) {
    %c0_i32 = arith.constant 0 : i32
    %c0_i32_0 = arith.constant 0 : i32
    return %arg0, %c0_i32 : i32, i32
  }
  func.func @transform_1(%arg0: i32) -> (i32, i32) {
    %c0_i32 = arith.constant 0 : i32
    %c0_i32_0 = arith.constant 0 : i32
    return %arg0, %c0_i32 : i32, i32
  }
  func.func @transform_2(%arg0: i32) -> (i32, i32) {
    %c0_i32 = arith.constant 0 : i32
    %c0_i32_0 = arith.constant 0 : i32
    %c0_i32_1 = arith.constant 0 : i32
    return %c0_i32, %c0_i32_0 : i32, i32
  }
  func.func @transform_3(%arg0: i32) -> (i32, i32) {
    %c0_i32 = arith.constant 0 : i32
    %c0_i32_0 = arith.constant 0 : i32
    %c0_i32_1 = arith.constant 0 : i32
    return %c0_i32, %c0_i32_0 : i32, i32
  }
  func.func @transform_4(%arg0: i32) -> (i32, i32) {
    %c0_i32 = arith.constant 0 : i32
    %c0_i32_0 = arith.constant 0 : i32
    %c0_i32_1 = arith.constant 0 : i32
    return %c0_i32, %c0_i32_0 : i32, i32
  }
  func.func @transform_5(%arg0: i32) -> (i32, i32) {
    %c0_i32 = arith.constant 0 : i32
    %c0_i32_0 = arith.constant 0 : i32
    %c0_i32_1 = arith.constant 0 : i32
    return %c0_i32, %c0_i32_0 : i32, i32
  }
  func.func @transform_6(%arg0: i32) -> (i32, i32) {
    %c0_i32 = arith.constant 0 : i32
    %c0_i32_0 = arith.constant 0 : i32
    %c0_i32_1 = arith.constant 0 : i32
    return %c0_i32, %c0_i32_0 : i32, i32
  }
  func.func @transform_7(%arg0: i32) -> (i32, i32) {
    %c0_i32 = arith.constant 0 : i32
    %c0_i32_0 = arith.constant 0 : i32
    %c0_i32_1 = arith.constant 0 : i32
    return %c0_i32, %c0_i32_0 : i32, i32
  }
  func.func @transform_8(%arg0: i32) -> (i32, i32) {
    %c0_i32 = arith.constant 0 : i32
    %c0_i32_0 = arith.constant 0 : i32
    return %arg0, %c0_i32 : i32, i32
  }
  func.func @transform_9(%arg0: i32) -> (i32, i32) {
    %c0_i32 = arith.constant 0 : i32
    %c0_i32_0 = arith.constant 0 : i32
    return %arg0, %c0_i32 : i32, i32
  }
}

</mosaic_0001>

<bundles_post_ra>
// kernel: our_model_forward.4
= control target key start
LH: loop header
LB: loop body
LE: loop exit
PB: predicated region body
PF: predicated region fallthrough
CT: control target
= control target key end

     0   :  { %s325_s12 = smov 0   ;;  %s354_s0 = inlined_call_operand.vmem [shape: f32[16,36], index: 0, kind: input, shape index: {}]   ;;  %s355_s1 = inlined_call_operand.vmem [shape: bf16[36,128], index: 1, kind: input, shape index: {}]   ;;  %s356_s2 = inlined_call_operand.vmem [shape: f32[1,128], index: 2, kind: input, shape index: {}]   ;;  %s357_s3 = inlined_call_operand.vmem [shape: f32[16,128], index: 3, kind: output, shape index: {}]  }
   0x1 LB: > { %s268_s13 = sadd.s32 4294967295, %s303_s12   ;;  %p272_p0 = scmp.ge.s32.totalorder %s303_s12, 1  ;;  %s303_s12 = sphi %s325_s12, %s13_s12  }
   0x2   : > { %p136_p1 = scmp.lt.s32.totalorder %s303_s12, 3 }
   0x4   : > { %p137_p2 = pnand %p272_p0, %p136_p1 }
   0x5   : > { %p158_p3 = scmp.lt.s32.totalorder (!%p137_p2), %s268_s13, 1 }
   0x6   : > { %140 = sbr.rel (%p137_p2) target bundleno = 162 (0xa2), region = 32 }
   0xb   : > { %v173_v0 = vld [vmem:[%s355_s1 + $0x10] sm:$0x3]  ;;  %vm197_vm0 = vcmask 1041408   ;;  %s359_s13 = smov (!%p158_p3, %s268_s13), 1  ;;  %v287_v4 = vld [vmem:[%s355_s1 + $0x8] sm:$0xff]  ;;  %v286_v5 = vld [vmem:[%s355_s1] sm:$0xff] }
   0xc   : > { %v187_v1 = vunpack.c.l.b16 %v173_v0  ;;  %s273_s16 = sshll.u32 %s359_s13, 3  ;;  %vm193_vm1 = vcmask 293888   ;;  %v296_v8 = vld [vmem:[%s356_s2] ss:$0 sm:$0xff] }
   0xd   : > { %s161_s21 = scalar_lea.vmem %s354_s0, %s273_s16  ;;  %s165_s28 = scalar_lea.vmem %s357_s3, %s273_s16 }
   0xe   : > { %v190_v2 = vpack.c.b16 %v187_v1, %v187_v1  ;;  %v167_v6 = vld [vmem:[%s161_s21] sm:$0xff] }
   0xf   : > { %v168_v7 = vpack.c.bf16 %v167_v6, %v167_v6 }
  0x10   : > { %v199_v3 = vsel %vm197_vm0, %v190_v2, 0 }
  0x11   : > { %206 = vmatpush.bf16.msra.mxu0 %v199_v3 }
  0x15   : > { %207 = vmatpush.bf16.msra.mxu0 %v287_v4 }
  0x19   : > { %208 = vmatpush.bf16.msra.mxu0 %v286_v5 }
  0x1c   : > { %283 = vmatmul.msk.bf16.vlgmr.msra.gmra.mxu0 %vm193_vm1, %v168_v7 }
  0x99   : > { %v210_v9 = vpop.f32.mrf.mxu0 }
  0x9a   : > { %v211_v10 = vadd.f32 %v296_v8, %v210_v9 }
  0x9c   : > { %214 = vst [vmem:[%s165_s28] sm:$0xff] %v211_v10 }
  0xa1   : > { %v212_v11 = vpop.f32.mrf.mxu0 }
  0xa2 PF: > { %s13_s12 = sadd.s32 1, %s303_s12  }
  0xa3   : > { %p10_p4 = scmp.ge.s32.totalorder %s13_s12, 4  }
  0xa5   :  { %12 = sbr.rel (!%p10_p4) target bundleno = 1 (0x1), region = 62 }

// kernel: our_model_forward.5
= control target key start
LH: loop header
LB: loop body
LE: loop exit
PB: predicated region body
PF: predicated region fallthrough
CT: control target
= control target key end

     0   :  { %s1246_s29 = smov 0   ;;  %s1381_s0 = inlined_call_operand.vmem [shape: f32[6,8,32], index: 0, kind: input, shape index: {}]   ;;  %s1382_s1 = inlined_call_operand.vmem [shape: f32[6,1,8], index: 1, kind: input, shape index: {}]   ;;  %s1383_s2 = inlined_call_operand.vmem [shape: f32[1,32], index: 2, kind: input, shape index: {}]   ;;  %s1384_s3 = inlined_call_operand.vmem [shape: f32[1,32], index: 3, kind: input, shape index: {}]   ;;  %s1385_s4 = inlined_call_operand.vmem [shape: bf16[32,96], index: 4, kind: input, shape index: {}]   ;;  %s1386_s5 = inlined_call_operand.vmem [shape: f32[1,96], index: 5, kind: input, shape index: {}]   ;;  %s1387_s6 = inlined_call_operand.vmem [shape: bf16[32,32], index: 6, kind: input, shape index: {}]   ;;  %s1388_s7 = inlined_call_operand.vmem [shape: f32[1,32], index: 7, kind: input, shape index: {}]   ;;  %s1389_s8 = inlined_call_operand.vmem [shape: f32[1,32], index: 8, kind: input, shape index: {}]   ;;  %s1390_s9 = inlined_call_operand.vmem [shape: f32[1,32], index: 9, kind: input, shape index: {}]   ;;  %s1391_s10 = inlined_call_operand.vmem [shape: bf16[32,32], index: 10, kind: input, shape index: {}]   ;;  %s1392_s11 = inlined_call_operand.vmem [shape: f32[1,32], index: 11, kind: input, shape index: {}]   ;;  %s1393_s12 = inlined_call_operand.vmem [shape: bf16[32,32], index: 12, kind: input, shape index: {}]   ;;  %s1394_s13 = inlined_call_operand.vmem [shape: f32[1,32], index: 13, kind: input, shape index: {}]   ;;  %s1395_s14 = inlined_call_operand.vmem [shape: f32[6,8,32], index: 14, kind: output, shape index: {}]  }
   0x1 LB: > { %s1030_s30 = sadd.s32 4294967295, %s1153_s29   ;;  %p1034_p0 = scmp.ge.s32.totalorder %s1153_s29, 1  ;;  %s1153_s29 = sphi %s1246_s29, %s24_s29  }
   0x2   : > { %p419_p1 = scmp.lt.s32.totalorder %s1153_s29, 7 }
   0x4   : > { %p420_p2 = pnand %p1034_p0, %p419_p1 }
   0x5   : > { %p466_p3 = scmp.lt.s32.totalorder (!%p420_p2), %s1030_s30, 5  ;;  %s1156_s16 = smov (!%p420_p2), 104  }
   0x6   : > { %423 = sbr.rel (%p420_p2) target bundleno = 1900 (0x76c), region = 76  ;;  %s1157_s17 = smov (!%p420_p2), 120  }
   0x7   : > { %s1159_s19 = smov (!%p420_p2), 72   ;;  %s1160_s20 = smov (!%p420_p2), 88  }
   0x8   : > { %s1161_s21 = smov (!%p420_p2), 112   ;;  %s1162_s22 = smov (!%p420_p2), 80  }
   0x9   : > { %s1164_s26 = smov (!%p420_p2), 64   ;;  %s1165_s27 = smov (!%p420_p2), 56  }
   0xa   : > { %s1166_s28 = smov (!%p420_p2), 40  }
   0xb   : > { %s1397_s30 = smov (!%p466_p3, %s1030_s30), 5  ;;  %vm481_vm0 = vcmask 261120   ;;  %v1155_v2 = vmov 32.0   ;;  %v1084_v14 = vld [vmem:[%s1385_s4 + $0x8] sm:$0xff]  ;;  %v1083_v15 = vld [vmem:[%s1385_s4] sm:$0xff]  ;;  %vm563_vm5 = vcmask 64512  }
   0xc   : > { %s1035_s15 = sshll.u32 %s1397_s30, 3  ;;  %1123 = vrcp.f32 %v1155_v2  ;;  %549 = vmatpush.bf16.msra.mxu0 %v1084_v14  ;;  %v1115_v25 = vld [vmem:[%s1383_s2] ss:$0 sm:$0xff]  ;;  %s472_s25 = scalar_lea.vmem %s1382_s1, %s1397_s30  ;;  %v1163_v49 = vmov -1e+09   ;;  %vm605_vm7 = vcmask 1043456  }
   0xd   : > { %s469_s18 = scalar_lea.vmem %s1381_s0, %s1035_s15  ;;  %v1116_v28 = vld [vmem:[%s1384_s3] ss:$0 sm:$0xff]  ;;  %vm809_vm8 = vcmask 130048   ;;  %vm811_vm9 = vcmask 195584  }
   0xe   : > { %v1262_v0 = vld [vmem:[%s469_s18] sm:$0xff]  ;;  %s1158_s18 = smov 96  }
   0xf   : > { %v482_v1 = vsel %vm481_vm0, %v1262_v0, 0.0  ;;  %v1117_v32 = vld [vmem:[%s1386_s5] ss:$0 sm:$0xff] }
  0x10   : > { %483 = vadd.xlane.f32.xlu0 %v482_v1  ;;  %550 = vmatpush.bf16.msra.mxu0 %v1083_v15  ;;  %v556_v48 = vld [vmem:[%s472_s25] sm:$0x1] }
  0x11   : > { %vm557_vm6 = vcmp.gt.f32.partialorder %v556_v48, 0.0 }
  0x12   : > { %v1124_v3 = vpop.eup %1123  ;;  %v558_v50 = vsel %vm557_vm6, 0.0, %v1163_v49 }
  0x13   : > { %v486_v4 = vmul.f32 32.0, %v1124_v3  ;;  %vm490_vm1 = vweird.f32 %v1124_v3  ;;  %v585_v51 = vperm.slane %v558_v50, 0 }
  0x15   : > { %v487_v5 = vsub.f32 1.0, %v486_v4 }
  0x17   : > { %v488_v6 = vmul.f32 %v1124_v3, %v487_v5 }
  0x19   : > { %v489_v7 = vadd.f32 %v1124_v3, %v488_v6 }
  0x1b   : > { %v1266_v8 = vsel %vm490_vm1, %v1124_v3, %v489_v7 }
  0x83   : > { %v484_v9 = vpop.xlane.xlu0 %483 }
  0x84   : > { %v492_v10 = vmul.f32 %v1266_v8, %v484_v9 }
  0x86   : > { %v493_v11 = vsub.f32 %v1262_v0, %v492_v10 }
  0x88   : > { %v494_v12 = vmul.f32 %v493_v11, %v493_v11 }
  0x8a   : > { %v495_v13 = vsel %vm481_vm0, %v494_v12, 0.0 }
  0x8b   : > { %496 = vadd.xlane.f32.xlu0 %v495_v13 }
  0xfe   : > { %v497_v16 = vpop.xlane.xlu0 %496 }
  0xff   : > { %v498_v17 = vmul.f32 %v497_v16, %v1266_v8 }
 0x101   : > { %v499_v18 = vadd.f32 1e-05, %v498_v17 }
 0x103   : > { %1125 = vrsqrt.f32 %v499_v18  ;;  %vm506_vm3 = vweird.f32 %v499_v18 }
 0x109   : > { %v1126_v19 = vpop.eup %1125 }
 0x10a   : > { %v501_v20 = vmul.f32 %v1126_v19, %v499_v18  ;;  %vm507_vm2 = vweird.f32 %v1126_v19 }
 0x10b   : > { %vm508_vm4 = vmor %vm506_vm3, %vm507_vm2 }
 0x10c   : > { %v502_v21 = vmul.f32 %v1126_v19, %v501_v20 }
 0x10e   : > { %v503_v22 = vmul.f32 0.5, %v502_v21 }
 0x110   : > { %v504_v23 = vsub.f32 1.5, %v503_v22 }
 0x112   : > { %v505_v24 = vmul.f32 %v1126_v19, %v504_v23 }
 0x114   : > { %v509_v26 = vsel %vm508_vm4, %v1126_v19, %v505_v24 }
 0x115   : > { %v510_v27 = vmul.f32 %v509_v26, %v493_v11 }
 0x117   : > { %v514_v29 = vmul.f32 %v1115_v25, %v510_v27 }
 0x119   : > { %v518_v30 = vadd.f32 %v1116_v28, %v514_v29 }
 0x11b   : > { %v519_v31 = vpack.c.bf16 %v518_v30, %v518_v30 }
 0x11d   : > { %1045 = vmatmul.msk.bf16.vlgmr.msra.gmra.mxu0 %vm481_vm0, %v519_v31 }
 0x19a   : > { %v552_v33 = vpop.f32.mrf.mxu0 }
 0x19b   : > { %v553_v34 = vadd.f32 %v1117_v32, %v552_v33 }
 0x19d   : > { %v1288_v35 = vpack.c.bf16 %v553_v34, %v553_v34 }
 0x19f   : > { %738 = vrot.lane.b32.xlu0 %v1288_v35, %s1156_s16  ;;  %622 = vrot.lane.b32.xlu2 %v1288_v35, %s1157_s17  ;;  %s1167_s16 = smov 48   ;;  %s1168_s17 = smov 8  }
 0x1a0   : > { %561 = vrot.lane.b32.xlu1 %v1288_v35, %s1158_s18  ;;  %s1169_s18 = smov 24  }
 0x1a2   : > { %v554_v36 = vpop.f32.mrf.mxu0 }
 0x1a7   : > { %740 = vrot.lane.b32.xlu2 %v1288_v35, %s1159_s19  ;;  %s1170_s19 = smov 16  }
 0x1a8   : > { %624 = vrot.lane.b32.xlu1 %v1288_v35, %s1160_s20 }
 0x1af   : > { %680 = vrot.lane.b32.xlu2 %v1288_v35, %s1161_s21 }
 0x1b0   : > { %682 = vrot.lane.b32.xlu1 %v1288_v35, %s1162_s22 }
 0x1f9   : > { %v623_v37 = vpop.permute.xlu2 %622 }
 0x201   : > { %v741_v40 = vpop.permute.xlu2 %740 }
 0x202   : > { %v746_v43 = vsel %vm563_vm5, %v741_v40, 0 }
 0x209   : > { %v681_v46 = vpop.permute.xlu2 %680 }
 0x211   : > { %v739_v47 = vpop.permute.xlu0 %738 }
 0x212   : > { %v562_v38 = vpop.permute.xlu1 %561 }
 0x213   : > { %v568_v39 = vsel %vm563_vm5, %v562_v38, 0 }
 0x214   : > { %577 = vmatpush.bf16.xpose.msra.mxu1 %v568_v39 }
 0x21a   : > { %v625_v41 = vpop.permute.xlu1 %624 }
 0x21b   : > { %1046 = vmatmul.msk.bf16.vlgmr.msra.gmra.mxu1 %vm563_vm5, %v1288_v35  ;;  %v630_v42 = vsel %vm563_vm5, %v625_v41, 0 }
 0x21c   : > { %639 = vmatpush.bf16.xpose.msra.mxu3 %v630_v42 }
 0x222   : > { %v683_v44 = vpop.permute.xlu1 %682 }
 0x223   : > { %1048 = vmatmul.msk.bf16.vlgmr.msra.gmra.mxu3 %vm563_vm5, %v623_v37  ;;  %v688_v45 = vsel %vm563_vm5, %v683_v44, 0 }
 0x224   : > { %755 = vmatpush.bf16.xpose.msrb.mxu3 %v746_v43  ;;  %697 = vmatpush.bf16.xpose.msrb.mxu0 %v688_v45 }
 0x22b   : > { %1050 = vmatmul.msk.bf16.vlgmr.msrb.gmra.mxu0 %vm563_vm5, %v681_v46 }
 0x233   : > { %1052 = vmatmul.msk.bf16.vlgmr.msrb.gmra.mxu3 %vm563_vm5, %v739_v47 }
 0x298   : > { %v579_v52 = vpop.f32.mrf.mxu1 }
 0x299   : > { %v583_v53 = vmul.f32 0.35355338, %v579_v52 }
 0x29b   : > { %v587_v54 = vadd.f32 %v585_v51, %v583_v53 }
 0x29d   : > { %v588_v55 = vsel %vm563_vm5, %v587_v54, -inf }
 0x29e   : > { %589 = vmax.xlane.f32.xlu1 %v588_v55 }
 0x2a0   : > { %v581_v56 = vpop.f32.mrf.mxu1 }
 0x2a6   : > { %v641_v57 = vpop.f32.mrf.mxu3 }
 0x2a7   : > { %v645_v58 = vmul.f32 0.35355338, %v641_v57 }
 0x2a8   : > { %v699_v59 = vpop.f32.mrf.mxu0 }
 0x2a9   : > { %v646_v60 = vadd.f32 %v645_v58, %v585_v51  ;;  %v703_v61 = vmul.f32 0.35355338, %v699_v59 }
 0x2ab   : > { %v647_v62 = vsel %vm563_vm5, %v646_v60, -inf  ;;  %v704_v1 = vadd.f32 %v703_v61, %v585_v51 }
 0x2ac   : > { %648 = vmax.xlane.f32.xlu2 %v647_v62  ;;  %v1086_v62 = vld [vmem:[%s1387_s6 + $0x8] sm:$0xff] }
 0x2ad   : > { %v705_v3 = vsel %vm563_vm5, %v704_v1, -inf  ;;  %843 = vmatpush.bf16.msra.mxu0 %v1086_v62 }
 0x2ae   : > { %v643_v63 = vpop.f32.mrf.mxu3 }
 0x2af   : > { %v1085_v63 = vld [vmem:[%s1387_s6] sm:$0xff] }
 0x2b0   : > { %v701_v2 = vpop.f32.mrf.mxu0 }
 0x2b1   : > { %844 = vmatpush.bf16.msra.mxu0 %v1085_v63 }
 0x2b4   : > { %706 = vmax.xlane.f32.xlu2 %v705_v3 }
 0x2b6   : > { %v757_v4 = vpop.f32.mrf.mxu3 }
 0x2b7   : > { %v761_v5 = vmul.f32 0.35355338, %v757_v4 }
 0x2b9   : > { %v762_v6 = vadd.f32 %v761_v5, %v585_v51 }
 0x2bb   : > { %v763_v7 = vsel %vm563_vm5, %v762_v6, -inf }
 0x2bc   : > { %764 = vmax.xlane.f32.xlu0 %v763_v7 }
 0x2be   : > { %v759_v9 = vpop.f32.mrf.mxu3 }
 0x2bf   : > { %v1118_v9 = vld [vmem:[%s1388_s7] ss:$0 sm:$0xff] }
 0x2cc   : > { %600 = vrot.lane.b32.xlu2 %v1288_v35, %s1164_s26 }
 0x2d0   : > { %659 = vrot.lane.b32.xlu0 %v1288_v35, %s1165_s27 }
 0x2d4   : > { %775 = vrot.lane.b32.xlu2 %v1288_v35, %s1166_s28 }
 0x2d8   : > { %717 = vrot.lane.b32.xlu0 %v1288_v35, %s1167_s16 }
 0x311   : > { %v590_v10 = vpop.xlane.xlu1 %589 }
 0x312   : > { %v591_v11 = vsub.f32 %v587_v54, %v590_v10 }
 0x314   : > { %v592_v12 = vmul.f32 1.442695, %v591_v11 }
 0x316   : > { %1127 = vpow2.f32 %v592_v12 }
 0x31c   : > { %v1128_v13 = vpop.eup %1127 }
 0x31d   : > { %v594_v14 = vsel %vm563_vm5, %v1128_v13, 0.0 }
 0x31e   : > { %595 = vadd.xlane.f32.xlu1 %v594_v14 }
 0x31f   : > { %v649_v15 = vpop.xlane.xlu2 %648 }
 0x320   : > { %v650_v16 = vsub.f32 %v646_v60, %v649_v15 }
 0x322   : > { %v651_v17 = vmul.f32 1.442695, %v650_v16 }
 0x324   : > { %1129 = vpow2.f32 %v651_v17 }
 0x327   : > { %v707_v18 = vpop.xlane.xlu2 %706 }
 0x328   : > { %v708_v25 = vsub.f32 %v704_v1, %v707_v18 }
 0x32a   : > { %v1130_v19 = vpop.eup %1129  ;;  %v709_v27 = vmul.f32 1.442695, %v708_v25 }
 0x32b   : > { %v653_v20 = vsel %vm563_vm5, %v1130_v19, 0.0 }
 0x32c   : > { %654 = vadd.xlane.f32.xlu1 %v653_v20  ;;  %v1088_v20 = vld [vmem:[%s1391_s10 + $0x8] sm:$0xff] }
 0x32f   : > { %v765_v21 = vpop.xlane.xlu0 %764  ;;  %v601_v22 = vpop.permute.xlu2 %600 }
 0x330   : > { %v766_v23 = vsub.f32 %v762_v6, %v765_v21  ;;  %v607_v24 = vsel %vm605_vm7, %v601_v22, 0 }
 0x331   : > { %616 = vmatpush.bf16.msra.mxu2 %v607_v24 }
 0x332   : > { %v767_v26 = vmul.f32 1.442695, %v766_v23 }
 0x334   : > { %1131 = vpow2.f32 %v767_v26 }
 0x335   : > { %1133 = vpow2.f32 %v709_v27 }
 0x337   : > { %v776_v39 = vpop.permute.xlu2 %775 }
 0x338   : > { %v781_v41 = vsel %vm605_vm7, %v776_v39, 0 }
 0x33a   : > { %v1132_v28 = vpop.eup %1131 }
 0x33b   : > { %v769_v29 = vsel %vm563_vm5, %v1132_v28, 0.0  ;;  %v1134_v30 = vpop.eup %1133 }
 0x33c   : > { %770 = vadd.xlane.f32.xlu1 %v769_v29  ;;  %v711_v33 = vsel %vm563_vm5, %v1134_v30, 0.0 }
 0x342   : > { %v660_v31 = vpop.permute.xlu0 %659 }
 0x343   : > { %v665_v32 = vsel %vm605_vm7, %v660_v31, 0 }
 0x344   : > { %674 = vmatpush.bf16.msrb.mxu2 %v665_v32  ;;  %712 = vadd.xlane.f32.xlu1 %v711_v33 }
 0x34a   : > { %v718_v34 = vpop.permute.xlu0 %717 }
 0x34b   : > { %v723_v35 = vsel %vm605_vm7, %v718_v34, 0 }
 0x34c   : > { %732 = vmatpush.bf16.msrb.mxu1 %v723_v35 }
 0x350   : > { %913 = vmatpush.bf16.msra.mxu1 %v1088_v20 }
 0x391   : > { %v596_v36 = vpop.xlane.xlu1 %595 }
 0x392   : > { %1135 = vrcp.f32 %v596_v36  ;;  %v1090_v36 = vld [vmem:[%s1393_s12 + $0x8] sm:$0xff] }
 0x393   : > { %959 = vmatpush.bf16.msra.mxu3 %v1090_v36 }
 0x398   : > { %v1136_v37 = vpop.eup %1135 }
 0x399   : > { %v598_v38 = vmul.f32 %v1136_v37, %v1128_v13  ;;  %v1089_v37 = vld [vmem:[%s1393_s12] sm:$0xff] }
 0x39a   : > { %960 = vmatpush.bf16.msra.mxu3 %v1089_v37 }
 0x39b   : > { %v599_v40 = vpack.c.bf16 %v598_v38, %v598_v38  ;;  %v1121_v38 = vld [vmem:[%s1392_s11] ss:$0 sm:$0xff] }
 0x39d   : > { %1047 = vmatmul.msk.bf16.vlgmr.msra.gmra.mxu2 %vm563_vm5, %v599_v40 }
 0x39e   : > { %790 = vmatpush.bf16.msra.mxu2 %v781_v41 }
 0x39f   : > { %v655_v42 = vpop.xlane.xlu1 %654 }
 0x3a0   : > { %1137 = vrcp.f32 %v655_v42 }
 0x3a6   : > { %v1138_v43 = vpop.eup %1137 }
 0x3a7   : > { %v657_v44 = vmul.f32 %v1138_v43, %v1130_v19 }
 0x3a9   : > { %v658_v45 = vpack.c.bf16 %v657_v44, %v657_v44 }
 0x3ad   : > { %1049 = vmatmul.msk.bf16.vlgmr.msrb.gmra.mxu2 %vm563_vm5, %v658_v45 }
 0x3af   : > { %v771_v46 = vpop.xlane.xlu1 %770 }
 0x3b0   : > { %1139 = vrcp.f32 %v771_v46 }
 0x3b6   : > { %v1140_v47 = vpop.eup %1139 }
 0x3b7   : > { %v773_v48 = vmul.f32 %v1140_v47, %v1132_v28  ;;  %v713_v49 = vpop.xlane.xlu1 %712 }
 0x3b8   : > { %1141 = vrcp.f32 %v713_v49 }
 0x3b9   : > { %v774_v50 = vpack.c.bf16 %v773_v48, %v773_v48 }
 0x3bd   : > { %1053 = vmatmul.msk.bf16.vlgmr.msra.gmra.mxu2 %vm563_vm5, %v774_v50 }
 0x3be   : > { %v1142_v51 = vpop.eup %1141 }
 0x3bf   : > { %v715_v52 = vmul.f32 %v1142_v51, %v1134_v30  ;;  %v1119_v30 = vld [vmem:[%s1389_s8] ss:$0 sm:$0xff] }
 0x3c1   : > { %v716_v53 = vpack.c.bf16 %v715_v52, %v715_v52  ;;  %v1122_v52 = vld [vmem:[%s1394_s13] ss:$0 sm:$0xff] }
 0x3c3   : > { %1051 = vmatmul.msk.bf16.vlgmr.msrb.gmra.mxu1 %vm563_vm5, %v716_v53 }
 0x420   : > { %v618_v54 = vpop.f32.mrf.mxu2 }
 0x428   : > { %v620_v55 = vpop.f32.mrf.mxu2 }
 0x430   : > { %v676_v56 = vpop.f32.mrf.mxu2 }
 0x431   : > { %797 = vrot.lane.b32.xlu1 %v676_v56, %s1168_s17 }
 0x438   : > { %v678_v57 = vpop.f32.mrf.mxu2 }
 0x440   : > { %v734_v58 = vpop.f32.mrf.mxu1  ;;  %v792_v59 = vpop.f32.mrf.mxu2 }
 0x441   : > { %805 = vrot.lane.b32.xlu0 %v792_v59, %s1169_s18  ;;  %801 = vrot.lane.b32.xlu2 %v734_v58, %s1170_s19  ;;  %s476_s18 = scalar_lea.vmem %s1395_s14, %s1035_s15 }
 0x448   : > { %v736_v60 = vpop.f32.mrf.mxu1  ;;  %v794_v61 = vpop.f32.mrf.mxu2 }
 0x49b   : > { %v802_v3 = vpop.permute.xlu2 %801 }
 0x4a3   : > { %v798_v1 = vpop.permute.xlu1 %797 }
 0x4a4   : > { %v808_v2 = vsel %vm563_vm5, %v618_v54, %v798_v1 }
 0x4a5   : > { %v810_v5 = vsel %vm809_vm8, %v808_v2, %v802_v3 }
 0x4b3   : > { %v806_v4 = vpop.permute.xlu0 %805 }
 0x4b4   : > { %v812_v6 = vsel %vm811_vm9, %v810_v5, %v806_v4 }
 0x4b5   : > { %v813_v7 = vpack.c.bf16 %v812_v6, %v812_v6 }
 0x4b7   : > { %1062 = vmatmul.msk.bf16.vlgmr.msra.gmra.mxu0 %vm481_vm0, %v813_v7 }
 0x534   : > { %v846_v10 = vpop.f32.mrf.mxu0 }
 0x535   : > { %v847_v11 = vadd.f32 %v1118_v9, %v846_v10 }
 0x537   : > { %v850_v12 = vadd.f32 %v847_v11, %v1262_v0  ;;  %v1087_v0 = vld [vmem:[%s1391_s10] sm:$0xff] }
 0x538   : > { %914 = vmatpush.bf16.msra.mxu1 %v1087_v0 }
 0x539   : > { %v853_v13 = vsel %vm481_vm0, %v850_v12, 0.0 }
 0x53a   : > { %854 = vadd.xlane.f32.xlu2 %v853_v13 }
 0x53c   : > { %v848_v14 = vpop.f32.mrf.mxu0 }
 0x5ad   : > { %v855_v15 = vpop.xlane.xlu2 %854 }
 0x5ae   : > { %v856_v16 = vmul.f32 %v855_v15, %v1266_v8 }
 0x5b0   : > { %v857_v17 = vsub.f32 %v850_v12, %v856_v16 }
 0x5b2   : > { %v858_v18 = vmul.f32 %v857_v17, %v857_v17 }
 0x5b4   : > { %v859_v19 = vsel %vm481_vm0, %v858_v18, 0.0 }
 0x5b5   : > { %860 = vadd.xlane.f32.xlu0 %v859_v19 }
 0x628   : > { %v861_v21 = vpop.xlane.xlu0 %860 }
 0x629   : > { %v862_v22 = vmul.f32 %v861_v21, %v1266_v8  ;;  %v1120_v8 = vld [vmem:[%s1390_s9] ss:$0 sm:$0xff] }
 0x62b   : > { %v863_v23 = vadd.f32 1e-05, %v862_v22 }
 0x62d   : > { %1143 = vrsqrt.f32 %v863_v23  ;;  %vm870_vm11 = vweird.f32 %v863_v23 }
 0x633   : > { %v1144_v24 = vpop.eup %1143 }
 0x634   : > { %v865_v25 = vmul.f32 %v1144_v24, %v863_v23  ;;  %vm871_vm10 = vweird.f32 %v1144_v24 }
 0x635   : > { %vm872_vm12 = vmor %vm870_vm11, %vm871_vm10 }
 0x636   : > { %v866_v26 = vmul.f32 %v1144_v24, %v865_v25 }
 0x638   : > { %v867_v27 = vmul.f32 0.5, %v866_v26 }
 0x63a   : > { %v868_v28 = vsub.f32 1.5, %v867_v27 }
 0x63c   : > { %v869_v29 = vmul.f32 %v1144_v24, %v868_v28 }
 0x63e   : > { %v873_v31 = vsel %vm872_vm12, %v1144_v24, %v869_v29 }
 0x63f   : > { %v874_v32 = vmul.f32 %v873_v31, %v857_v17 }
 0x641   : > { %v878_v33 = vmul.f32 %v1119_v30, %v874_v32 }
 0x643   : > { %v882_v34 = vadd.f32 %v1120_v8, %v878_v33 }
 0x645   : > { %v883_v35 = vpack.c.bf16 %v882_v34, %v882_v34 }
 0x647   : > { %1071 = vmatmul.msk.bf16.vlgmr.msra.gmra.mxu1 %vm481_vm0, %v883_v35 }
 0x6c4   : > { %v916_v39 = vpop.f32.mrf.mxu1 }
 0x6c5   : > { %v917_v40 = vadd.f32 %v1121_v38, %v916_v39 }
 0x6c7   : > { %v920_v41 = vmul.f32 %v917_v40, %v917_v40 }
 0x6c9   : > { %v921_v42 = vmul.f32 %v920_v41, %v917_v40 }
 0x6cb   : > { %v922_v43 = vmul.f32 0.044715, %v921_v42 }
 0x6cc   : > { %v918_v44 = vpop.f32.mrf.mxu1 }
 0x6cd   : > { %v923_v45 = vadd.f32 %v922_v43, %v917_v40 }
 0x6cf   : > { %v924_v46 = vmul.f32 0.7978846, %v923_v45 }
 0x6d1   : > { %1145 = vtanh.f32 %v924_v46 }
 0x6d7   : > { %v1146_v47 = vpop.eup %1145 }
 0x6d8   : > { %v926_v48 = vadd.f32 1.0, %v1146_v47 }
 0x6da   : > { %v927_v49 = vmul.f32 0.5, %v926_v48 }
 0x6dc   : > { %v928_v50 = vmul.f32 %v927_v49, %v917_v40 }
 0x6de   : > { %v929_v51 = vpack.c.bf16 %v928_v50, %v928_v50 }
 0x6e0   : > { %1080 = vmatmul.msk.bf16.vlgmr.msra.gmra.mxu3 %vm481_vm0, %v929_v51 }
 0x763   : > { %v962_v53 = vpop.f32.mrf.mxu3 }
 0x764   : > { %v963_v54 = vadd.f32 %v1122_v52, %v962_v53 }
 0x766   : > { %v966_v55 = vadd.f32 %v963_v54, %v850_v12 }
 0x768   : > { %967 = vst.msk [vmem:[%s476_s18] sm:$0xff] %vm481_vm0, %v966_v55 }
 0x76b   : > { %v964_v56 = vpop.f32.mrf.mxu3 }
 0x76c PF: > { %s24_s29 = sadd.s32 1, %s1153_s29  }
 0x76d   : > { %p21_p4 = scmp.ge.s32.totalorder %s24_s29, 8  }
 0x76f   :  { %23 = sbr.rel (!%p21_p4) target bundleno = 1 (0x1), region = 109 }

// kernel: our_model_forward.7
= control target key start
LH: loop header
LB: loop body
LE: loop exit
PB: predicated region body
PF: predicated region fallthrough
CT: control target
= control target key end

     0   :  { %s841_s30 = smov 0   ;;  %s936_s0 = inlined_call_operand.vmem [shape: f32[16,96], index: 0, kind: input, shape index: {}]   ;;  %s937_s1 = inlined_call_operand.vmem [shape: f32[16,96], index: 1, kind: input, shape index: {}]   ;;  %s938_s2 = inlined_call_operand.vmem [shape: bf16[96,128], index: 2, kind: input, shape index: {}]   ;;  %s939_s3 = inlined_call_operand.vmem [shape: f32[1,128], index: 3, kind: input, shape index: {}]   ;;  %s940_s4 = inlined_call_operand.vmem [shape: bf16[96,96], index: 4, kind: input, shape index: {}]   ;;  %s941_s5 = inlined_call_operand.vmem [shape: f32[1,96], index: 5, kind: input, shape index: {}]   ;;  %s942_s6 = inlined_call_operand.vmem [shape: bf16[96,128], index: 6, kind: input, shape index: {}]   ;;  %s943_s7 = inlined_call_operand.vmem [shape: f32[1,128], index: 7, kind: input, shape index: {}]   ;;  %s944_s8 = inlined_call_operand.vmem [shape: f32[16,128], index: 8, kind: output, shape index: {0}]   ;;  %s945_s9 = inlined_call_operand.vmem [shape: f32[16,128], index: 9, kind: output, shape index: {1}]  }
   0x1 LB: > { %s668_s10 = sadd.s32 4294967295, %s789_s30   ;;  %p672_p0 = scmp.ge.s32.totalorder %s789_s30, 1  ;;  %s789_s30 = sphi %s841_s30, %s20_s30  }
   0x2   : > { %p298_p1 = scmp.lt.s32.totalorder %s789_s30, 3 }
   0x4   : > { %p299_p2 = pnand %p672_p0, %p298_p1 }
   0x5   : > { %p340_p3 = scmp.lt.s32.totalorder (!%p299_p2), %s668_s10, 1 }
   0x6   : > { %302 = sbr.rel (%p299_p2) target bundleno = 309 (0x135), region = 52 }
   0xb   : > { %v765_v0 = vld [vmem:[%s940_s4 + $0x28] sm:$0xff]  ;;  %v764_v1 = vld [vmem:[%s940_s4 + $0x20] sm:$0xff]  ;;  %s947_s10 = smov (!%p340_p3, %s668_s10), 1  ;;  %v763_v6 = vld [vmem:[%s940_s4 + $0x18] sm:$0xff]  ;;  %vm411_vm0 = vcmask 785408  }
   0xc   : > { %489 = vmatpush.bf16.msra.mxu1 %v765_v0  ;;  %v759_v2 = vld [vmem:[%s938_s2 + $0x28] sm:$0xff]  ;;  %v758_v4 = vld [vmem:[%s938_s2 + $0x20] sm:$0xff]  ;;  %s870_s25 = sshll.u32 %s947_s10, 3  ;;  %v757_v7 = vld [vmem:[%s938_s2 + $0x18] sm:$0xff] }
   0xd   : > { %v771_v3 = vld [vmem:[%s942_s6 + $0x28] sm:$0xff]  ;;  %417 = vmatpush.bf16.msra.mxu0 %v759_v2  ;;  %v770_v5 = vld [vmem:[%s942_s6 + $0x20] sm:$0xff]  ;;  %v769_v8 = vld [vmem:[%s942_s6 + $0x18] sm:$0xff]  ;;  %s343_s14 = scalar_lea.vmem %s936_s0, %s870_s25  ;;  %s347_s17 = scalar_lea.vmem %s937_s1, %s870_s25 }
   0xe   : > { %560 = vmatpush.bf16.msra.mxu2 %v771_v3  ;;  %v762_v9 = vld [vmem:[%s940_s4 + $0x10] sm:$0xff]  ;;  %v761_v12 = vld [vmem:[%s940_s4 + $0x8] sm:$0xff]  ;;  %v357_v13 = vld [vmem:[%s343_s14] sm:$0xff]  ;;  %s355_s21 = scalar_lea.vmem %s945_s9, %s870_s25  ;;  %s351_s27 = scalar_lea.vmem %s944_s8, %s870_s25 }
   0xf   : > { %v756_v10 = vld [vmem:[%s938_s2 + $0x10] sm:$0xff]  ;;  %v429_v14 = vld [vmem:[%s347_s17] sm:$0xff]  ;;  %v755_v15 = vld [vmem:[%s938_s2 + $0x8] sm:$0xff]  ;;  %v358_v22 = vpack.c.bf16 %v357_v13, %v357_v13 }
  0x10   : > { %490 = vmatpush.bf16.msra.mxu1 %v764_v1  ;;  %v768_v11 = vld [vmem:[%s942_s6 + $0x10] sm:$0xff]  ;;  %v430_v16 = vmul.f32 %v429_v14, %v357_v13  ;;  %v760_v17 = vld [vmem:[%s940_s4] sm:$0xff]  ;;  %v767_v19 = vld [vmem:[%s942_s6 + $0x8] sm:$0xff] }
  0x11   : > { %418 = vmatpush.bf16.msra.mxu0 %v758_v4  ;;  %v754_v20 = vld [vmem:[%s938_s2] sm:$0xff] }
  0x12   : > { %561 = vmatpush.bf16.msra.mxu2 %v770_v5  ;;  %v431_v18 = vpack.c.bf16 %v430_v16, %v430_v16  ;;  %v766_v21 = vld [vmem:[%s942_s6] sm:$0xff] }
  0x13   : > { %v780_v23 = vld [vmem:[%s941_s5] ss:$0 sm:$0xff] }
  0x14   : > { %491 = vmatpush.bf16.msra.mxu1 %v763_v6  ;;  %v781_v30 = vld [vmem:[%s939_s3] ss:$0 sm:$0xff] }
  0x15   : > { %419 = vmatpush.bf16.msra.mxu0 %v757_v7  ;;  %v782_v34 = vld [vmem:[%s943_s7] ss:$0 sm:$0xff] }
  0x16   : > { %562 = vmatpush.bf16.msra.mxu2 %v769_v8 }
  0x18   : > { %492 = vmatpush.bf16.msra.mxu1 %v762_v9 }
  0x19   : > { %420 = vmatpush.bf16.msra.mxu0 %v756_v10 }
  0x1a   : > { %563 = vmatpush.bf16.msra.mxu2 %v768_v11 }
  0x1c   : > { %493 = vmatpush.bf16.msra.mxu1 %v761_v12 }
  0x1d   : > { %421 = vmatpush.bf16.msra.mxu0 %v755_v15 }
  0x1e   : > { %564 = vmatpush.bf16.msra.mxu2 %v767_v19 }
  0x20   : > { %494 = vmatpush.bf16.msra.mxu1 %v760_v17 }
  0x21   : > { %422 = vmatpush.bf16.msra.mxu0 %v754_v20 }
  0x22   : > { %565 = vmatpush.bf16.msra.mxu2 %v766_v21 }
  0x23   : > { %726 = vmatmul.msk.bf16.vlgmr.msra.gmra.mxu1 %vm411_vm0, %v431_v18 }
  0x24   : > { %701 = vmatmul.msk.bf16.vlgmr.msra.gmra.mxu0 %vm411_vm0, %v358_v22 }
  0xa0   : > { %v496_v24 = vpop.f32.mrf.mxu1 }
  0xa1   : > { %v497_v25 = vadd.f32 %v780_v23, %v496_v24  ;;  %v424_v31 = vpop.f32.mrf.mxu0 }
  0xa2   : > { %v425_v32 = vadd.f32 %v781_v30, %v424_v31 }
  0xa3   : > { %v500_v26 = vmax.f32 %v497_v25, 0.0 }
  0xa4   : > { %428 = vst [vmem:[%s355_s21] sm:$0xff] %v425_v32 }
  0xa5   : > { %v501_v27 = vadd.f32 %v500_v26, %v430_v16 }
  0xa7   : > { %v502_v28 = vpack.c.bf16 %v501_v27, %v501_v27 }
  0xa8   : > { %v498_v29 = vpop.f32.mrf.mxu1 }
  0xa9   : > { %751 = vmatmul.msk.bf16.vlgmr.msra.gmra.mxu2 %vm411_vm0, %v502_v28  ;;  %v426_v33 = vpop.f32.mrf.mxu0 }
 0x12c   : > { %v567_v35 = vpop.f32.mrf.mxu2 }
 0x12d   : > { %v568_v36 = vadd.f32 %v782_v34, %v567_v35 }
 0x12f   : > { %571 = vst [vmem:[%s351_s27] sm:$0xff] %v568_v36 }
 0x134   : > { %v569_v37 = vpop.f32.mrf.mxu2 }
 0x135 PF: > { %s20_s30 = sadd.s32 1, %s789_s30  }
 0x136   : > { %p17_p4 = scmp.ge.s32.totalorder %s20_s30, 4  }
 0x138   :  { %19 = sbr.rel (!%p17_p4) target bundleno = 1 (0x1), region = 97 }

</bundles_post_ra>
